<compile_context>
chip_gen: v6e
topology: v6e:2x2x1
jax: 0.10.0
libtpu: 0.0.40
codegen_flags: <defaults>
</compile_context>

<pallas_src>
import functools
import math

import jax
import jax.numpy as jnp
from jax import lax
from jax.experimental import pallas as pl
from jax.experimental.pallas import tpu as pltpu


def _block_kernel(*refs, W, K, pad, Cin, Chid, PADF, BHW, has_sc, downsample):
    it = iter(refs)
    x_ref = next(it)          # (1, Cin, BHW) bf16
    w1_ref = next(it)         # (K*K, Chid, Cin) bf16
    w2_ref = next(it)         # (K*K, Cout, Chid) bf16
    mask_ref = next(it)       # (K*K, 1, BHW) bf16 validity masks (1 = in-bounds)
    wsc_ref = next(it) if has_sc else None        # (Cout, Cin) bf16
    pmat_ref = next(it) if downsample else None   # (BHW, B*OH*OW) bf16
    out_ref = next(it)        # (1, Cout, B*OH*OW or BHW) bf16
    xpad_ref = next(it)       # (Cin,  BHW + 2*PADF) bf16 scratch
    hpad_ref = next(it)       # (Chid, BHW + 2*PADF) bf16 scratch

    cdt = xpad_ref.dtype

    # Zero only the halo slack every step (cheap: 4 tiny stores).  The interiors
    # are fully overwritten below; the masks zero logically-out-of-bounds taps,
    # but the slack must hold real zeros so stale-VMEM NaNs can't leak through
    # the 0-mask multiply.  (Done per-step, not on step 0 only, so it stays
    # correct when the grid axis is split across v7x's two TensorCores.)
    zx = jnp.zeros((Cin, PADF), cdt)
    xpad_ref[:, pl.ds(0, PADF)] = zx
    xpad_ref[:, pl.ds(PADF + BHW, PADF)] = zx
    zh = jnp.zeros((Chid, PADF), cdt)
    hpad_ref[:, pl.ds(0, PADF)] = zh
    hpad_ref[:, pl.ds(PADF + BHW, PADF)] = zh

    x = x_ref[0]                                            # (Cin, BHW) bf16

    def conv3x3(src_ref, w_ref):
        # 9 per-tap MXU matmuls accumulated in f32 vregs; tap shifts are static
        # lane-offset slices of the slack-padded staging buffer, masked by the
        # precomputed validity masks (zero padding + batch-image boundaries).
        acc = None
        for ky in range(K):
            for kx in range(K):
                t = ky * K + kx
                off = (ky - pad) * W + (kx - pad)
                piece = src_ref[:, pl.ds(PADF + off, BHW)]  # (C, BHW) bf16
                if (ky, kx) != (pad, pad):
                    piece = piece * mask_ref[t]             # (1, BHW) broadcast
                contrib = jnp.dot(w_ref[t], piece,
                                  preferred_element_type=jnp.float32)
                acc = contrib if acc is None else acc + contrib
        return acc                                          # (Co, BHW) f32

    # ---- residual branch: c2( relu( c1( relu(x) ) ) )
    xpad_ref[:, pl.ds(PADF, BHW)] = jnp.maximum(x, 0)
    h = conv3x3(xpad_ref, w1_ref)
    h = jnp.maximum(h, 0.0)
    hpad_ref[:, pl.ds(PADF, BHW)] = h.astype(cdt)
    res = conv3x3(hpad_ref, w2_ref)                         # (Cout, BHW) f32

    # ---- shortcut branch
    if has_sc:
        sc = jnp.dot(wsc_ref[...], x, preferred_element_type=jnp.float32)
    else:
        sc = x.astype(jnp.float32)                          # identity (Cin == Cout)

    total = res + sc                                        # (Cout, BHW) f32

    if downsample:
        # pool(res) + pool(sc) == pool(res + sc): one lane-dense pooling matmul.
        pooled = jnp.dot(total.astype(cdt), pmat_ref[...],
                         preferred_element_type=jnp.float32)
        out_ref[0] = pooled.astype(out_ref.dtype)
    else:
        out_ref[0] = total.astype(out_ref.dtype)


def block_forward(x_nchw, w1_oihw, w2_oihw, wsc_oihw=None, *,
                  downsample=False, ksize=3, pad=1):
    """Pallas forward of `Block`.  NCHW in, NCHW out (bf16)."""
    N, Cin, H, W = x_nchw.shape
    Chid = w1_oihw.shape[0]
    Cout = w2_oihw.shape[0]
    assert ksize == 2 * pad + 1, "residual add requires size-preserving convs"
    has_sc = wsc_oihw is not None
    if not has_sc:
        # PyTorch Block: non-learnable shortcut only when in==out and no downsample.
        assert Cin == Cout and not downsample, "identity shortcut needs Cin==Cout, no downsample"
    if downsample:
        assert H % 2 == 0 and W % 2 == 0
    OH, OW = (H // 2, W // 2) if downsample else (H, W)
    HW, OHW = H * W, OH * OW
    KK = ksize * ksize
    cdt = jnp.bfloat16

    halo = pad * W + pad                          # max |flat tap offset|
    PADF = max(128, ((halo + 127) // 128) * 128)  # lane-aligned slack width
    assert halo <= PADF

    # --- B_TILE selection: fold batch pairs into the lane axis, but keep the
    #     grid >= 2 steps (v7x megacore) and stay inside a conservative VMEM
    #     budget derived for v7x (64 MiB physical / 32 MiB default scoped).
    def vmem_bytes(bt):
        bhw, bohw = bt * HW, bt * OHW
        est = 0
        est += 2 * Cin * bhw * 2                              # x block, double-buffered bf16
        est += 2 * Cout * bohw * 2                            # out block, double-buffered bf16
        est += 2 * 2 * KK * (Chid * Cin + Cout * Chid)        # conv weights
        est += 2 * 2 * Cout * Cin                             # shortcut weight
        est += 2 * KK * bhw * 2                               # tap masks
        if downsample:
            est += 2 * bhw * bohw * 2                         # pooling matrix
        est += (Cin + Chid) * (bhw + 2 * PADF) * 2            # haloed staging scratch
        est += (Chid + Cin + 2 * Cout) * bhw * 4              # f32 live values / spill slack
        return est

    B_TILE = 1
    if N % 2 == 0 and N // 2 >= 2 and vmem_bytes(2) <= 24 * 1024 * 1024:
        B_TILE = 2
    G = N // B_TILE
    BHW, BOHW = B_TILE * HW, B_TILE * OHW
    vlimit = int(min(max(2 * vmem_bytes(B_TILE), 16 << 20), 64 << 20))

    # NCHW -> (G, Cin, B_TILE*HW): batch pairs side-by-side along the lane axis.
    x = x_nchw.astype(cdt).reshape(G, B_TILE, Cin, HW)
    x = jnp.transpose(x, (0, 2, 1, 3)).reshape(G, Cin, BHW)

    # OIHW -> per-tap (K*K, O, I) weight stacks.
    w1 = jnp.transpose(w1_oihw, (2, 3, 0, 1)).reshape(KK, Chid, Cin).astype(cdt)
    w2 = jnp.transpose(w2_oihw, (2, 3, 0, 1)).reshape(KK, Cout, Chid).astype(cdt)

    # Per-tap validity masks (zero padding + batch-image boundaries), built once.
    p = jnp.arange(HW)
    hh, ww = p // W, p % W
    rows = []
    for ky in range(ksize):
        for kx in range(ksize):
            dy, dx = ky - pad, kx - pad
            rows.append((hh + dy >= 0) & (hh + dy <= H - 1) &
                        (ww + dx >= 0) & (ww + dx <= W - 1))
    masks = jnp.stack(rows).astype(cdt)                       # (KK, HW)
    masks = jnp.tile(masks, (1, B_TILE)).reshape(KK, 1, BHW)

    inputs = [x, w1, w2, masks]
    in_specs = [
        pl.BlockSpec((1, Cin, BHW), lambda g: (g, 0, 0)),
        pl.BlockSpec((KK, Chid, Cin), lambda g: (0, 0, 0)),
        pl.BlockSpec((KK, Cout, Chid), lambda g: (0, 0, 0)),
        pl.BlockSpec((KK, 1, BHW), lambda g: (0, 0, 0)),
    ]
    if has_sc:
        wsc = wsc_oihw[:, :, 0, 0].astype(cdt)                # (Cout, Cin)
        inputs.append(wsc)
        in_specs.append(pl.BlockSpec((Cout, Cin), lambda g: (0, 0)))
    if downsample:
        # Block-diagonal 2x2 avg-pool matrix over the lane-folded batch images.
        # TODO(synk): for large H*W switch to a row-strip grid axis instead.
        src = jnp.arange(BHW)
        sb, sp = src // HW, src % HW
        sh, sw = sp // W, sp % W
        dst = jnp.arange(BOHW)
        db, dq = dst // OHW, dst % OHW
        dh, dw = dq // OW, dq % OW
        sel = ((sb[:, None] == db[None, :]) &
               ((sh // 2)[:, None] == dh[None, :]) &
               ((sw // 2)[:, None] == dw[None, :]))
        pmat = (sel.astype(jnp.float32) * 0.25).astype(cdt)   # (BHW, BOHW)
        inputs.append(pmat)
        in_specs.append(pl.BlockSpec((BHW, BOHW), lambda g: (0, 0)))

    kern = functools.partial(
        _block_kernel, W=W, K=ksize, pad=pad, Cin=Cin, Chid=Chid,
        PADF=PADF, BHW=BHW, has_sc=has_sc, downsample=downsample)

    out = pl.pallas_call(
        kern,
        out_shape=jax.ShapeDtypeStruct((G, Cout, BOHW), jnp.bfloat16),
        grid_spec=pltpu.PrefetchScalarGridSpec(
            num_scalar_prefetch=0,
            grid=(G,),
            in_specs=in_specs,
            out_specs=pl.BlockSpec((1, Cout, BOHW), lambda g: (g, 0, 0)),
            scratch_shapes=[
                pltpu.VMEM((Cin, BHW + 2 * PADF), cdt),       # relu(x) staging, slack-padded
                pltpu.VMEM((Chid, BHW + 2 * PADF), cdt),      # relu(conv1) staging
            ],
        ),
        compiler_params=pltpu.CompilerParams(
            dimension_semantics=("parallel",),
            vmem_limit_bytes=vlimit),
    )(*inputs)

    # (G, Cout, B_TILE*OH*OW) -> NCHW.
    out = out.reshape(G, Cout, B_TILE, OHW)
    out = jnp.transpose(out, (0, 2, 1, 3)).reshape(N, Cout, OH, OW)
    return out


# ------------------------- pure-JAX reference -------------------------------
def block_reference(x, w1, w2, wsc, downsample):
    # Mirrors the kernel's quantization points (bf16 inputs/weights, bf16-staged
    # hidden activation, bf16 pre-pool and bf16 output; f32 accumulation).
    q = lambda t: t.astype(jnp.bfloat16).astype(jnp.float32)
    conv = lambda h, w, p: lax.conv_general_dilated(
        h, w, (1, 1), ((p, p), (p, p)),
        dimension_numbers=("NCHW", "OIHW", "NCHW"),
        precision=lax.Precision.HIGHEST)
    xq = q(x)
    h = jax.nn.relu(xq)
    h = conv(h, q(w1), 1)
    h = jax.nn.relu(h)
    h = q(h)
    h = conv(h, q(w2), 1)
    sc = xq if wsc is None else conv(xq, q(wsc), 0)
    out = h + sc
    if downsample:
        out = q(out)
        n, c, hh, ww = out.shape
        out = out.reshape(n, c, hh // 2, 2, ww // 2, 2).mean(axis=(3, 5))
    return q(out)


def xavier_uniform(key, shape_oihw, gain):
    o, i, kh, kw = shape_oihw
    fan_in, fan_out = i * kh * kw, o * kh * kw
    a = gain * math.sqrt(6.0 / (fan_in + fan_out))
    return jax.random.uniform(key, shape_oihw, jnp.float32, -a, a)


def _check(out, ref, name):
    o = out.astype(jnp.float32)
    r = ref.astype(jnp.float32)
    err = jnp.abs(o - r)
    tol = 0.02 + 0.03 * jnp.abs(r)      # covers occasional 1-ulp bf16 rounding flips
    assert bool(jnp.all(err <= tol)), f"{name}: max abs err {float(jnp.max(err))}"
    assert float(jnp.mean(err)) < 5e-3, f"{name}: mean abs err {float(jnp.mean(err))}"


if __name__ == "__main__":
    key = jax.random.PRNGKey(0)
    k1, k2, k3, k4, k5, kx1, kx2 = jax.random.split(key, 7)

    # Case 1: Block(in=4, out=8, hidden=None->4, ksize=3, pad=1,
    #               downsample=True, bn=False)  -> learnable 1x1 shortcut.
    N, Cin, H, W = 4, 4, 16, 16
    Chid, Cout = Cin, 8
    w1 = xavier_uniform(k1, (Chid, Cin, 3, 3), math.sqrt(2.0))
    w2 = xavier_uniform(k2, (Cout, Chid, 3, 3), math.sqrt(2.0))
    wsc = xavier_uniform(k3, (Cout, Cin, 1, 1), 1.0)
    x = jax.random.normal(kx1, (N, Cin, H, W), jnp.float32)

    out1 = jax.block_until_ready(block_forward(x, w1, w2, wsc, downsample=True))
    assert out1.shape == (N, Cout, H // 2, W // 2), out1.shape
    _check(out1, block_reference(x, w1, w2, wsc, True), "downsample+learnable_sc")

    # Case 2: Block(in=8, out=8, downsample=False) -> identity (non-learnable)
    # shortcut, no pooling.
    C2 = 8
    w1b = xavier_uniform(k4, (C2, C2, 3, 3), math.sqrt(2.0))
    w2b = xavier_uniform(k5, (C2, C2, 3, 3), math.sqrt(2.0))
    xb = jax.random.normal(kx2, (N, C2, H, W), jnp.float32)

    out2 = jax.block_until_ready(block_forward(xb, w1b, w2b, None, downsample=False))
    assert out2.shape == (N, C2, H, W), out2.shape
    _check(out2, block_reference(xb, w1b, w2b, None, False), "identity_sc")

    print("KERNEL_OK")
</pallas_src>

<mosaic_0001>
module attributes {stable_mosaic.version = 11 : i64} {
  func.func @_block_kernel(%arg0: i32, %arg1: memref<1x4x512xbf16, #tpu.memory_space<vmem>>, %arg2: memref<9x4x4xbf16, #tpu.memory_space<vmem>>, %arg3: memref<9x8x4xbf16, #tpu.memory_space<vmem>>, %arg4: memref<9x1x512xbf16, #tpu.memory_space<vmem>>, %arg5: memref<8x4xbf16, #tpu.memory_space<vmem>>, %arg6: memref<512x128xbf16, #tpu.memory_space<vmem>>, %arg7: memref<1x8x128xbf16, #tpu.memory_space<vmem>>, %arg8: memref<4x768xbf16, #tpu.memory_space<vmem>>, %arg9: memref<4x768xbf16, #tpu.memory_space<vmem>>) attributes {dimension_semantics = [#tpu.dimension_semantics<parallel>], iteration_bounds = array<i64: 2>, scalar_prefetch = 0 : i64, scratch_operands = 2 : i64, tpu.core_type = #tpu.core_type<tc>, window_params = [{transform_indices = @transform_0, window_bounds = array<i64: 1, 4, 512>}, {pipeline_mode = #tpu.pipeline_mode<synchronous>, transform_indices = @transform_1, window_bounds = array<i64: 9, 4, 4>}, {pipeline_mode = #tpu.pipeline_mode<synchronous>, transform_indices = @transform_2, window_bounds = array<i64: 9, 8, 4>}, {pipeline_mode = #tpu.pipeline_mode<synchronous>, transform_indices = @transform_3, window_bounds = array<i64: 9, 1, 512>}, {pipeline_mode = #tpu.pipeline_mode<synchronous>, transform_indices = @transform_4, window_bounds = array<i64: 8, 4>}, {pipeline_mode = #tpu.pipeline_mode<synchronous>, transform_indices = @transform_5, window_bounds = array<i64: 512, 128>}, {transform_indices = @transform_6, window_bounds = array<i64: 1, 8, 128>}]} {
    %cst = arith.constant 0.000000e+00 : bf16
    %0 = vector.broadcast %cst : bf16 to vector<4x128xbf16>
    %c0 = arith.constant 0 : index
    %c0_0 = arith.constant 0 : index
    %1 = vector.load %arg8[%c0, %c0_0] : memref<4x768xbf16, #tpu.memory_space<vmem>>, vector<4x128xbf16>
    tpu.vector_store %arg8[%c0, %c0_0], %0 {strides = array<i32>} : memref<4x768xbf16, #tpu.memory_space<vmem>>, vector<4x128xbf16>,
    %c0_1 = arith.constant 0 : index
    %c640 = arith.constant 640 : index
    %2 = vector.load %arg8[%c0_1, %c640] : memref<4x768xbf16, #tpu.memory_space<vmem>>, vector<4x128xbf16>
    tpu.vector_store %arg8[%c0_1, %c640], %0 {strides = array<i32>} : memref<4x768xbf16, #tpu.memory_space<vmem>>, vector<4x128xbf16>,
    %cst_2 = arith.constant 0.000000e+00 : bf16
    %3 = vector.broadcast %cst_2 : bf16 to vector<4x128xbf16>
    %c0_3 = arith.constant 0 : index
    %c0_4 = arith.constant 0 : index
    %4 = vector.load %arg9[%c0_3, %c0_4] : memref<4x768xbf16, #tpu.memory_space<vmem>>, vector<4x128xbf16>
    tpu.vector_store %arg9[%c0_3, %c0_4], %3 {strides = array<i32>} : memref<4x768xbf16, #tpu.memory_space<vmem>>, vector<4x128xbf16>,
    %c0_5 = arith.constant 0 : index
    %c640_6 = arith.constant 640 : index
    %5 = vector.load %arg9[%c0_5, %c640_6] : memref<4x768xbf16, #tpu.memory_space<vmem>>, vector<4x128xbf16>
    tpu.vector_store %arg9[%c0_5, %c640_6], %3 {strides = array<i32>} : memref<4x768xbf16, #tpu.memory_space<vmem>>, vector<4x128xbf16>,
    %c0_7 = arith.constant 0 : index
    %c0_8 = arith.constant 0 : index
    %c0_9 = arith.constant 0 : index
    %6 = vector.load %arg1[%c0_7, %c0_8, %c0_9] : memref<1x4x512xbf16, #tpu.memory_space<vmem>>, vector<1x4x512xbf16>
    %7 = vector.shape_cast %6 : vector<1x4x512xbf16> to vector<4x512xbf16>
    %cst_10 = arith.constant 0.000000e+00 : bf16
    %8 = vector.broadcast %cst_10 : bf16 to vector<4x512xbf16>
    %9 = arith.maximumf %7, %8 : vector<4x512xbf16>
    %c0_11 = arith.constant 0 : index
    %c128 = arith.constant 128 : index
    %10 = vector.load %arg8[%c0_11, %c128] : memref<4x768xbf16, #tpu.memory_space<vmem>>, vector<4x512xbf16>
    tpu.vector_store %arg8[%c0_11, %c128], %9 {strides = array<i32>} : memref<4x768xbf16, #tpu.memory_space<vmem>>, vector<4x512xbf16>,
    %c0_12 = arith.constant 0 : index
    %c111 = arith.constant 111 : index
    %11 = vector.load %arg8[%c0_12, %c111] : memref<4x768xbf16, #tpu.memory_space<vmem>>, vector<4x512xbf16>
    %c0_13 = arith.constant 0 : index
    %c0_14 = arith.constant 0 : index
    %c0_15 = arith.constant 0 : index
    %12 = vector.load %arg4[%c0_13, %c0_14, %c0_15] : memref<9x1x512xbf16, #tpu.memory_space<vmem>>, vector<1x1x512xbf16>
    %13 = vector.shape_cast %12 : vector<1x1x512xbf16> to vector<1x512xbf16>
    %14 = vector.broadcast %13 : vector<1x512xbf16> to vector<4x512xbf16>
    %15 = arith.mulf %11, %14 : vector<4x512xbf16>
    %c0_16 = arith.constant 0 : index
    %c0_17 = arith.constant 0 : index
    %c0_18 = arith.constant 0 : index
    %16 = vector.load %arg2[%c0_16, %c0_17, %c0_18] : memref<9x4x4xbf16, #tpu.memory_space<vmem>>, vector<1x4x4xbf16>
    %17 = vector.shape_cast %16 : vector<1x4x4xbf16> to vector<4x4xbf16>
    %cst_19 = arith.constant dense<0.000000e+00> : vector<4x512xf32>
    %18 = tpu.matmul %17, %15, %cst_19 {dimension_numbers = #tpu.dot_dimension_numbers<[1], [0], [0], [1], [0, 0, 1, 1], [], []>} : vector<4x4xbf16>, vector<4x512xbf16>, vector<4x512xf32> -> vector<4x512xf32>
    %c0_20 = arith.constant 0 : index
    %c112 = arith.constant 112 : index
    %19 = vector.load %arg8[%c0_20, %c112] : memref<4x768xbf16, #tpu.memory_space<vmem>>, vector<4x512xbf16>
    %c1 = arith.constant 1 : index
    %c0_21 = arith.constant 0 : index
    %c0_22 = arith.constant 0 : index
    %20 = vector.load %arg4[%c1, %c0_21, %c0_22] : memref<9x1x512xbf16, #tpu.memory_space<vmem>>, vector<1x1x512xbf16>
    %21 = vector.shape_cast %20 : vector<1x1x512xbf16> to vector<1x512xbf16>
    %22 = vector.broadcast %21 : vector<1x512xbf16> to vector<4x512xbf16>
    %23 = arith.mulf %19, %22 : vector<4x512xbf16>
    %c1_23 = arith.constant 1 : index
    %c0_24 = arith.constant 0 : index
    %c0_25 = arith.constant 0 : index
    %24 = vector.load %arg2[%c1_23, %c0_24, %c0_25] : memref<9x4x4xbf16, #tpu.memory_space<vmem>>, vector<1x4x4xbf16>
    %25 = vector.shape_cast %24 : vector<1x4x4xbf16> to vector<4x4xbf16>
    %cst_26 = arith.constant dense<0.000000e+00> : vector<4x512xf32>
    %26 = tpu.matmul %25, %23, %cst_26 {dimension_numbers = #tpu.dot_dimension_numbers<[1], [0], [0], [1], [0, 0, 1, 1], [], []>} : vector<4x4xbf16>, vector<4x512xbf16>, vector<4x512xf32> -> vector<4x512xf32>
    %27 = arith.addf %18, %26 : vector<4x512xf32>
    %c0_27 = arith.constant 0 : index
    %c113 = arith.constant 113 : index
    %28 = vector.load %arg8[%c0_27, %c113] : memref<4x768xbf16, #tpu.memory_space<vmem>>, vector<4x512xbf16>
    %c2 = arith.constant 2 : index
    %c0_28 = arith.constant 0 : index
    %c0_29 = arith.constant 0 : index
    %29 = vector.load %arg4[%c2, %c0_28, %c0_29] : memref<9x1x512xbf16, #tpu.memory_space<vmem>>, vector<1x1x512xbf16>
    %30 = vector.shape_cast %29 : vector<1x1x512xbf16> to vector<1x512xbf16>
    %31 = vector.broadcast %30 : vector<1x512xbf16> to vector<4x512xbf16>
    %32 = arith.mulf %28, %31 : vector<4x512xbf16>
    %c2_30 = arith.constant 2 : index
    %c0_31 = arith.constant 0 : index
    %c0_32 = arith.constant 0 : index
    %33 = vector.load %arg2[%c2_30, %c0_31, %c0_32] : memref<9x4x4xbf16, #tpu.memory_space<vmem>>, vector<1x4x4xbf16>
    %34 = vector.shape_cast %33 : vector<1x4x4xbf16> to vector<4x4xbf16>
    %cst_33 = arith.constant dense<0.000000e+00> : vector<4x512xf32>
    %35 = tpu.matmul %34, %32, %cst_33 {dimension_numbers = #tpu.dot_dimension_numbers<[1], [0], [0], [1], [0, 0, 1, 1], [], []>} : vector<4x4xbf16>, vector<4x512xbf16>, vector<4x512xf32> -> vector<4x512xf32>
    %36 = arith.addf %27, %35 : vector<4x512xf32>
    %c0_34 = arith.constant 0 : index
    %c127 = arith.constant 127 : index
    %37 = vector.load %arg8[%c0_34, %c127] : memref<4x768xbf16, #tpu.memory_space<vmem>>, vector<4x512xbf16>
    %c3 = arith.constant 3 : index
    %c0_35 = arith.constant 0 : index
    %c0_36 = arith.constant 0 : index
    %38 = vector.load %arg4[%c3, %c0_35, %c0_36] : memref<9x1x512xbf16, #tpu.memory_space<vmem>>, vector<1x1x512xbf16>
    %39 = vector.shape_cast %38 : vector<1x1x512xbf16> to vector<1x512xbf16>
    %40 = vector.broadcast %39 : vector<1x512xbf16> to vector<4x512xbf16>
    %41 = arith.mulf %37, %40 : vector<4x512xbf16>
    %c3_37 = arith.constant 3 : index
    %c0_38 = arith.constant 0 : index
    %c0_39 = arith.constant 0 : index
    %42 = vector.load %arg2[%c3_37, %c0_38, %c0_39] : memref<9x4x4xbf16, #tpu.memory_space<vmem>>, vector<1x4x4xbf16>
    %43 = vector.shape_cast %42 : vector<1x4x4xbf16> to vector<4x4xbf16>
    %cst_40 = arith.constant dense<0.000000e+00> : vector<4x512xf32>
    %44 = tpu.matmul %43, %41, %cst_40 {dimension_numbers = #tpu.dot_dimension_numbers<[1], [0], [0], [1], [0, 0, 1, 1], [], []>} : vector<4x4xbf16>, vector<4x512xbf16>, vector<4x512xf32> -> vector<4x512xf32>
    %45 = arith.addf %36, %44 : vector<4x512xf32>
    %c0_41 = arith.constant 0 : index
    %c128_42 = arith.constant 128 : index
    %46 = vector.load %arg8[%c0_41, %c128_42] : memref<4x768xbf16, #tpu.memory_space<vmem>>, vector<4x512xbf16>
    %c4 = arith.constant 4 : index
    %c0_43 = arith.constant 0 : index
    %c0_44 = arith.constant 0 : index
    %47 = vector.load %arg2[%c4, %c0_43, %c0_44] : memref<9x4x4xbf16, #tpu.memory_space<vmem>>, vector<1x4x4xbf16>
    %48 = vector.shape_cast %47 : vector<1x4x4xbf16> to vector<4x4xbf16>
    %cst_45 = arith.constant dense<0.000000e+00> : vector<4x512xf32>
    %49 = tpu.matmul %48, %46, %cst_45 {dimension_numbers = #tpu.dot_dimension_numbers<[1], [0], [0], [1], [0, 0, 1, 1], [], []>} : vector<4x4xbf16>, vector<4x512xbf16>, vector<4x512xf32> -> vector<4x512xf32>
    %50 = arith.addf %45, %49 : vector<4x512xf32>
    %c0_46 = arith.constant 0 : index
    %c129 = arith.constant 129 : index
    %51 = vector.load %arg8[%c0_46, %c129] : memref<4x768xbf16, #tpu.memory_space<vmem>>, vector<4x512xbf16>
    %c5 = arith.constant 5 : index
    %c0_47 = arith.constant 0 : index
    %c0_48 = arith.constant 0 : index
    %52 = vector.load %arg4[%c5, %c0_47, %c0_48] : memref<9x1x512xbf16, #tpu.memory_space<vmem>>, vector<1x1x512xbf16>
    %53 = vector.shape_cast %52 : vector<1x1x512xbf16> to vector<1x512xbf16>
    %54 = vector.broadcast %53 : vector<1x512xbf16> to vector<4x512xbf16>
    %55 = arith.mulf %51, %54 : vector<4x512xbf16>
    %c5_49 = arith.constant 5 : index
    %c0_50 = arith.constant 0 : index
    %c0_51 = arith.constant 0 : index
    %56 = vector.load %arg2[%c5_49, %c0_50, %c0_51] : memref<9x4x4xbf16, #tpu.memory_space<vmem>>, vector<1x4x4xbf16>
    %57 = vector.shape_cast %56 : vector<1x4x4xbf16> to vector<4x4xbf16>
    %cst_52 = arith.constant dense<0.000000e+00> : vector<4x512xf32>
    %58 = tpu.matmul %57, %55, %cst_52 {dimension_numbers = #tpu.dot_dimension_numbers<[1], [0], [0], [1], [0, 0, 1, 1], [], []>} : vector<4x4xbf16>, vector<4x512xbf16>, vector<4x512xf32> -> vector<4x512xf32>
    %59 = arith.addf %50, %58 : vector<4x512xf32>
    %c0_53 = arith.constant 0 : index
    %c143 = arith.constant 143 : index
    %60 = vector.load %arg8[%c0_53, %c143] : memref<4x768xbf16, #tpu.memory_space<vmem>>, vector<4x512xbf16>
    %c6 = arith.constant 6 : index
    %c0_54 = arith.constant 0 : index
    %c0_55 = arith.constant 0 : index
    %61 = vector.load %arg4[%c6, %c0_54, %c0_55] : memref<9x1x512xbf16, #tpu.memory_space<vmem>>, vector<1x1x512xbf16>
    %62 = vector.shape_cast %61 : vector<1x1x512xbf16> to vector<1x512xbf16>
    %63 = vector.broadcast %62 : vector<1x512xbf16> to vector<4x512xbf16>
    %64 = arith.mulf %60, %63 : vector<4x512xbf16>
    %c6_56 = arith.constant 6 : index
    %c0_57 = arith.constant 0 : index
    %c0_58 = arith.constant 0 : index
    %65 = vector.load %arg2[%c6_56, %c0_57, %c0_58] : memref<9x4x4xbf16, #tpu.memory_space<vmem>>, vector<1x4x4xbf16>
    %66 = vector.shape_cast %65 : vector<1x4x4xbf16> to vector<4x4xbf16>
    %cst_59 = arith.constant dense<0.000000e+00> : vector<4x512xf32>
    %67 = tpu.matmul %66, %64, %cst_59 {dimension_numbers = #tpu.dot_dimension_numbers<[1], [0], [0], [1], [0, 0, 1, 1], [], []>} : vector<4x4xbf16>, vector<4x512xbf16>, vector<4x512xf32> -> vector<4x512xf32>
    %68 = arith.addf %59, %67 : vector<4x512xf32>
    %c0_60 = arith.constant 0 : index
    %c144 = arith.constant 144 : index
    %69 = vector.load %arg8[%c0_60, %c144] : memref<4x768xbf16, #tpu.memory_space<vmem>>, vector<4x512xbf16>
    %c7 = arith.constant 7 : index
    %c0_61 = arith.constant 0 : index
    %c0_62 = arith.constant 0 : index
    %70 = vector.load %arg4[%c7, %c0_61, %c0_62] : memref<9x1x512xbf16, #tpu.memory_space<vmem>>, vector<1x1x512xbf16>
    %71 = vector.shape_cast %70 : vector<1x1x512xbf16> to vector<1x512xbf16>
    %72 = vector.broadcast %71 : vector<1x512xbf16> to vector<4x512xbf16>
    %73 = arith.mulf %69, %72 : vector<4x512xbf16>
    %c7_63 = arith.constant 7 : index
    %c0_64 = arith.constant 0 : index
    %c0_65 = arith.constant 0 : index
    %74 = vector.load %arg2[%c7_63, %c0_64, %c0_65] : memref<9x4x4xbf16, #tpu.memory_space<vmem>>, vector<1x4x4xbf16>
    %75 = vector.shape_cast %74 : vector<1x4x4xbf16> to vector<4x4xbf16>
    %cst_66 = arith.constant dense<0.000000e+00> : vector<4x512xf32>
    %76 = tpu.matmul %75, %73, %cst_66 {dimension_numbers = #tpu.dot_dimension_numbers<[1], [0], [0], [1], [0, 0, 1, 1], [], []>} : vector<4x4xbf16>, vector<4x512xbf16>, vector<4x512xf32> -> vector<4x512xf32>
    %77 = arith.addf %68, %76 : vector<4x512xf32>
    %c0_67 = arith.constant 0 : index
    %c145 = arith.constant 145 : index
    %78 = vector.load %arg8[%c0_67, %c145] : memref<4x768xbf16, #tpu.memory_space<vmem>>, vector<4x512xbf16>
    %c8 = arith.constant 8 : index
    %c0_68 = arith.constant 0 : index
    %c0_69 = arith.constant 0 : index
    %79 = vector.load %arg4[%c8, %c0_68, %c0_69] : memref<9x1x512xbf16, #tpu.memory_space<vmem>>, vector<1x1x512xbf16>
    %80 = vector.shape_cast %79 : vector<1x1x512xbf16> to vector<1x512xbf16>
    %81 = vector.broadcast %80 : vector<1x512xbf16> to vector<4x512xbf16>
    %82 = arith.mulf %78, %81 : vector<4x512xbf16>
    %c8_70 = arith.constant 8 : index
    %c0_71 = arith.constant 0 : index
    %c0_72 = arith.constant 0 : index
    %83 = vector.load %arg2[%c8_70, %c0_71, %c0_72] : memref<9x4x4xbf16, #tpu.memory_space<vmem>>, vector<1x4x4xbf16>
    %84 = vector.shape_cast %83 : vector<1x4x4xbf16> to vector<4x4xbf16>
    %cst_73 = arith.constant dense<0.000000e+00> : vector<4x512xf32>
    %85 = tpu.matmul %84, %82, %cst_73 {dimension_numbers = #tpu.dot_dimension_numbers<[1], [0], [0], [1], [0, 0, 1, 1], [], []>} : vector<4x4xbf16>, vector<4x512xbf16>, vector<4x512xf32> -> vector<4x512xf32>
    %86 = arith.addf %77, %85 : vector<4x512xf32>
    %cst_74 = arith.constant 0.000000e+00 : f32
    %87 = vector.broadcast %cst_74 : f32 to vector<4x512xf32>
    %88 = arith.maximumf %86, %87 : vector<4x512xf32>
    %89 = arith.truncf %88 : vector<4x512xf32> to vector<4x512xbf16>
    %c0_75 = arith.constant 0 : index
    %c128_76 = arith.constant 128 : index
    %90 = vector.load %arg9[%c0_75, %c128_76] : memref<4x768xbf16, #tpu.memory_space<vmem>>, vector<4x512xbf16>
    tpu.vector_store %arg9[%c0_75, %c128_76], %89 {strides = array<i32>} : memref<4x768xbf16, #tpu.memory_space<vmem>>, vector<4x512xbf16>,
    %c0_77 = arith.constant 0 : index
    %c111_78 = arith.constant 111 : index
    %91 = vector.load %arg9[%c0_77, %c111_78] : memref<4x768xbf16, #tpu.memory_space<vmem>>, vector<4x512xbf16>
    %c0_79 = arith.constant 0 : index
    %c0_80 = arith.constant 0 : index
    %c0_81 = arith.constant 0 : index
    %92 = vector.load %arg4[%c0_79, %c0_80, %c0_81] : memref<9x1x512xbf16, #tpu.memory_space<vmem>>, vector<1x1x512xbf16>
    %93 = vector.shape_cast %92 : vector<1x1x512xbf16> to vector<1x512xbf16>
    %94 = vector.broadcast %93 : vector<1x512xbf16> to vector<4x512xbf16>
    %95 = arith.mulf %91, %94 : vector<4x512xbf16>
    %c0_82 = arith.constant 0 : index
    %c0_83 = arith.constant 0 : index
    %c0_84 = arith.constant 0 : index
    %96 = vector.load %arg3[%c0_82, %c0_83, %c0_84] : memref<9x8x4xbf16, #tpu.memory_space<vmem>>, vector<1x8x4xbf16>
    %97 = vector.shape_cast %96 : vector<1x8x4xbf16> to vector<8x4xbf16>
    %cst_85 = arith.constant dense<0.000000e+00> : vector<8x512xf32>
    %98 = tpu.matmul %97, %95, %cst_85 {dimension_numbers = #tpu.dot_dimension_numbers<[1], [0], [0], [1], [0, 0, 1, 1], [], []>} : vector<8x4xbf16>, vector<4x512xbf16>, vector<8x512xf32> -> vector<8x512xf32>
    %c0_86 = arith.constant 0 : index
    %c112_87 = arith.constant 112 : index
    %99 = vector.load %arg9[%c0_86, %c112_87] : memref<4x768xbf16, #tpu.memory_space<vmem>>, vector<4x512xbf16>
    %c1_88 = arith.constant 1 : index
    %c0_89 = arith.constant 0 : index
    %c0_90 = arith.constant 0 : index
    %100 = vector.load %arg4[%c1_88, %c0_89, %c0_90] : memref<9x1x512xbf16, #tpu.memory_space<vmem>>, vector<1x1x512xbf16>
    %101 = vector.shape_cast %100 : vector<1x1x512xbf16> to vector<1x512xbf16>
    %102 = vector.broadcast %101 : vector<1x512xbf16> to vector<4x512xbf16>
    %103 = arith.mulf %99, %102 : vector<4x512xbf16>
    %c1_91 = arith.constant 1 : index
    %c0_92 = arith.constant 0 : index
    %c0_93 = arith.constant 0 : index
    %104 = vector.load %arg3[%c1_91, %c0_92, %c0_93] : memref<9x8x4xbf16, #tpu.memory_space<vmem>>, vector<1x8x4xbf16>
    %105 = vector.shape_cast %104 : vector<1x8x4xbf16> to vector<8x4xbf16>
    %cst_94 = arith.constant dense<0.000000e+00> : vector<8x512xf32>
    %106 = tpu.matmul %105, %103, %cst_94 {dimension_numbers = #tpu.dot_dimension_numbers<[1], [0], [0], [1], [0, 0, 1, 1], [], []>} : vector<8x4xbf16>, vector<4x512xbf16>, vector<8x512xf32> -> vector<8x512xf32>
    %107 = arith.addf %98, %106 : vector<8x512xf32>
    %c0_95 = arith.constant 0 : index
    %c113_96 = arith.constant 113 : index
    %108 = vector.load %arg9[%c0_95, %c113_96] : memref<4x768xbf16, #tpu.memory_space<vmem>>, vector<4x512xbf16>
    %c2_97 = arith.constant 2 : index
    %c0_98 = arith.constant 0 : index
    %c0_99 = arith.constant 0 : index
    %109 = vector.load %arg4[%c2_97, %c0_98, %c0_99] : memref<9x1x512xbf16, #tpu.memory_space<vmem>>, vector<1x1x512xbf16>
    %110 = vector.shape_cast %109 : vector<1x1x512xbf16> to vector<1x512xbf16>
    %111 = vector.broadcast %110 : vector<1x512xbf16> to vector<4x512xbf16>
    %112 = arith.mulf %108, %111 : vector<4x512xbf16>
    %c2_100 = arith.constant 2 : index
    %c0_101 = arith.constant 0 : index
    %c0_102 = arith.constant 0 : index
    %113 = vector.load %arg3[%c2_100, %c0_101, %c0_102] : memref<9x8x4xbf16, #tpu.memory_space<vmem>>, vector<1x8x4xbf16>
    %114 = vector.shape_cast %113 : vector<1x8x4xbf16> to vector<8x4xbf16>
    %cst_103 = arith.constant dense<0.000000e+00> : vector<8x512xf32>
    %115 = tpu.matmul %114, %112, %cst_103 {dimension_numbers = #tpu.dot_dimension_numbers<[1], [0], [0], [1], [0, 0, 1, 1], [], []>} : vector<8x4xbf16>, vector<4x512xbf16>, vector<8x512xf32> -> vector<8x512xf32>
    %116 = arith.addf %107, %115 : vector<8x512xf32>
    %c0_104 = arith.constant 0 : index
    %c127_105 = arith.constant 127 : index
    %117 = vector.load %arg9[%c0_104, %c127_105] : memref<4x768xbf16, #tpu.memory_space<vmem>>, vector<4x512xbf16>
    %c3_106 = arith.constant 3 : index
    %c0_107 = arith.constant 0 : index
    %c0_108 = arith.constant 0 : index
    %118 = vector.load %arg4[%c3_106, %c0_107, %c0_108] : memref<9x1x512xbf16, #tpu.memory_space<vmem>>, vector<1x1x512xbf16>
    %119 = vector.shape_cast %118 : vector<1x1x512xbf16> to vector<1x512xbf16>
    %120 = vector.broadcast %119 : vector<1x512xbf16> to vector<4x512xbf16>
    %121 = arith.mulf %117, %120 : vector<4x512xbf16>
    %c3_109 = arith.constant 3 : index
    %c0_110 = arith.constant 0 : index
    %c0_111 = arith.constant 0 : index
    %122 = vector.load %arg3[%c3_109, %c0_110, %c0_111] : memref<9x8x4xbf16, #tpu.memory_space<vmem>>, vector<1x8x4xbf16>
    %123 = vector.shape_cast %122 : vector<1x8x4xbf16> to vector<8x4xbf16>
    %cst_112 = arith.constant dense<0.000000e+00> : vector<8x512xf32>
    %124 = tpu.matmul %123, %121, %cst_112 {dimension_numbers = #tpu.dot_dimension_numbers<[1], [0], [0], [1], [0, 0, 1, 1], [], []>} : vector<8x4xbf16>, vector<4x512xbf16>, vector<8x512xf32> -> vector<8x512xf32>
    %125 = arith.addf %116, %124 : vector<8x512xf32>
    %c0_113 = arith.constant 0 : index
    %c128_114 = arith.constant 128 : index
    %126 = vector.load %arg9[%c0_113, %c128_114] : memref<4x768xbf16, #tpu.memory_space<vmem>>, vector<4x512xbf16>
    %c4_115 = arith.constant 4 : index
    %c0_116 = arith.constant 0 : index
    %c0_117 = arith.constant 0 : index
    %127 = vector.load %arg3[%c4_115, %c0_116, %c0_117] : memref<9x8x4xbf16, #tpu.memory_space<vmem>>, vector<1x8x4xbf16>
    %128 = vector.shape_cast %127 : vector<1x8x4xbf16> to vector<8x4xbf16>
    %cst_118 = arith.constant dense<0.000000e+00> : vector<8x512xf32>
    %129 = tpu.matmul %128, %126, %cst_118 {dimension_numbers = #tpu.dot_dimension_numbers<[1], [0], [0], [1], [0, 0, 1, 1], [], []>} : vector<8x4xbf16>, vector<4x512xbf16>, vector<8x512xf32> -> vector<8x512xf32>
    %130 = arith.addf %125, %129 : vector<8x512xf32>
    %c0_119 = arith.constant 0 : index
    %c129_120 = arith.constant 129 : index
    %131 = vector.load %arg9[%c0_119, %c129_120] : memref<4x768xbf16, #tpu.memory_space<vmem>>, vector<4x512xbf16>
    %c5_121 = arith.constant 5 : index
    %c0_122 = arith.constant 0 : index
    %c0_123 = arith.constant 0 : index
    %132 = vector.load %arg4[%c5_121, %c0_122, %c0_123] : memref<9x1x512xbf16, #tpu.memory_space<vmem>>, vector<1x1x512xbf16>
    %133 = vector.shape_cast %132 : vector<1x1x512xbf16> to vector<1x512xbf16>
    %134 = vector.broadcast %133 : vector<1x512xbf16> to vector<4x512xbf16>
    %135 = arith.mulf %131, %134 : vector<4x512xbf16>
    %c5_124 = arith.constant 5 : index
    %c0_125 = arith.constant 0 : index
    %c0_126 = arith.constant 0 : index
    %136 = vector.load %arg3[%c5_124, %c0_125, %c0_126] : memref<9x8x4xbf16, #tpu.memory_space<vmem>>, vector<1x8x4xbf16>
    %137 = vector.shape_cast %136 : vector<1x8x4xbf16> to vector<8x4xbf16>
    %cst_127 = arith.constant dense<0.000000e+00> : vector<8x512xf32>
    %138 = tpu.matmul %137, %135, %cst_127 {dimension_numbers = #tpu.dot_dimension_numbers<[1], [0], [0], [1], [0, 0, 1, 1], [], []>} : vector<8x4xbf16>, vector<4x512xbf16>, vector<8x512xf32> -> vector<8x512xf32>
    %139 = arith.addf %130, %138 : vector<8x512xf32>
    %c0_128 = arith.constant 0 : index
    %c143_129 = arith.constant 143 : index
    %140 = vector.load %arg9[%c0_128, %c143_129] : memref<4x768xbf16, #tpu.memory_space<vmem>>, vector<4x512xbf16>
    %c6_130 = arith.constant 6 : index
    %c0_131 = arith.constant 0 : index
    %c0_132 = arith.constant 0 : index
    %141 = vector.load %arg4[%c6_130, %c0_131, %c0_132] : memref<9x1x512xbf16, #tpu.memory_space<vmem>>, vector<1x1x512xbf16>
    %142 = vector.shape_cast %141 : vector<1x1x512xbf16> to vector<1x512xbf16>
    %143 = vector.broadcast %142 : vector<1x512xbf16> to vector<4x512xbf16>
    %144 = arith.mulf %140, %143 : vector<4x512xbf16>
    %c6_133 = arith.constant 6 : index
    %c0_134 = arith.constant 0 : index
    %c0_135 = arith.constant 0 : index
    %145 = vector.load %arg3[%c6_133, %c0_134, %c0_135] : memref<9x8x4xbf16, #tpu.memory_space<vmem>>, vector<1x8x4xbf16>
    %146 = vector.shape_cast %145 : vector<1x8x4xbf16> to vector<8x4xbf16>
    %cst_136 = arith.constant dense<0.000000e+00> : vector<8x512xf32>
    %147 = tpu.matmul %146, %144, %cst_136 {dimension_numbers = #tpu.dot_dimension_numbers<[1], [0], [0], [1], [0, 0, 1, 1], [], []>} : vector<8x4xbf16>, vector<4x512xbf16>, vector<8x512xf32> -> vector<8x512xf32>
    %148 = arith.addf %139, %147 : vector<8x512xf32>
    %c0_137 = arith.constant 0 : index
    %c144_138 = arith.constant 144 : index
    %149 = vector.load %arg9[%c0_137, %c144_138] : memref<4x768xbf16, #tpu.memory_space<vmem>>, vector<4x512xbf16>
    %c7_139 = arith.constant 7 : index
    %c0_140 = arith.constant 0 : index
    %c0_141 = arith.constant 0 : index
    %150 = vector.load %arg4[%c7_139, %c0_140, %c0_141] : memref<9x1x512xbf16, #tpu.memory_space<vmem>>, vector<1x1x512xbf16>
    %151 = vector.shape_cast %150 : vector<1x1x512xbf16> to vector<1x512xbf16>
    %152 = vector.broadcast %151 : vector<1x512xbf16> to vector<4x512xbf16>
    %153 = arith.mulf %149, %152 : vector<4x512xbf16>
    %c7_142 = arith.constant 7 : index
    %c0_143 = arith.constant 0 : index
    %c0_144 = arith.constant 0 : index
    %154 = vector.load %arg3[%c7_142, %c0_143, %c0_144] : memref<9x8x4xbf16, #tpu.memory_space<vmem>>, vector<1x8x4xbf16>
    %155 = vector.shape_cast %154 : vector<1x8x4xbf16> to vector<8x4xbf16>
    %cst_145 = arith.constant dense<0.000000e+00> : vector<8x512xf32>
    %156 = tpu.matmul %155, %153, %cst_145 {dimension_numbers = #tpu.dot_dimension_numbers<[1], [0], [0], [1], [0, 0, 1, 1], [], []>} : vector<8x4xbf16>, vector<4x512xbf16>, vector<8x512xf32> -> vector<8x512xf32>
    %157 = arith.addf %148, %156 : vector<8x512xf32>
    %c0_146 = arith.constant 0 : index
    %c145_147 = arith.constant 145 : index
    %158 = vector.load %arg9[%c0_146, %c145_147] : memref<4x768xbf16, #tpu.memory_space<vmem>>, vector<4x512xbf16>
    %c8_148 = arith.constant 8 : index
    %c0_149 = arith.constant 0 : index
    %c0_150 = arith.constant 0 : index
    %159 = vector.load %arg4[%c8_148, %c0_149, %c0_150] : memref<9x1x512xbf16, #tpu.memory_space<vmem>>, vector<1x1x512xbf16>
    %160 = vector.shape_cast %159 : vector<1x1x512xbf16> to vector<1x512xbf16>
    %161 = vector.broadcast %160 : vector<1x512xbf16> to vector<4x512xbf16>
    %162 = arith.mulf %158, %161 : vector<4x512xbf16>
    %c8_151 = arith.constant 8 : index
    %c0_152 = arith.constant 0 : index
    %c0_153 = arith.constant 0 : index
    %163 = vector.load %arg3[%c8_151, %c0_152, %c0_153] : memref<9x8x4xbf16, #tpu.memory_space<vmem>>, vector<1x8x4xbf16>
    %164 = vector.shape_cast %163 : vector<1x8x4xbf16> to vector<8x4xbf16>
    %cst_154 = arith.constant dense<0.000000e+00> : vector<8x512xf32>
    %165 = tpu.matmul %164, %162, %cst_154 {dimension_numbers = #tpu.dot_dimension_numbers<[1], [0], [0], [1], [0, 0, 1, 1], [], []>} : vector<8x4xbf16>, vector<4x512xbf16>, vector<8x512xf32> -> vector<8x512xf32>
    %166 = arith.addf %157, %165 : vector<8x512xf32>
    %c0_155 = arith.constant 0 : index
    %c0_156 = arith.constant 0 : index
    %167 = vector.load %arg5[%c0_155, %c0_156] : memref<8x4xbf16, #tpu.memory_space<vmem>>, vector<8x4xbf16>
    %cst_157 = arith.constant dense<0.000000e+00> : vector<8x512xf32>
    %168 = tpu.matmul %167, %7, %cst_157 {dimension_numbers = #tpu.dot_dimension_numbers<[1], [0], [0], [1], [0, 0, 1, 1], [], []>} : vector<8x4xbf16>, vector<4x512xbf16>, vector<8x512xf32> -> vector<8x512xf32>
    %169 = arith.addf %166, %168 : vector<8x512xf32>
    %170 = arith.truncf %169 : vector<8x512xf32> to vector<8x512xbf16>
    %c0_158 = arith.constant 0 : index
    %c0_159 = arith.constant 0 : index
    %171 = vector.load %arg6[%c0_158, %c0_159] : memref<512x128xbf16, #tpu.memory_space<vmem>>, vector<512x128xbf16>
    %cst_160 = arith.constant dense<0.000000e+00> : vector<8x128xf32>
    %172 = tpu.matmul %170, %171, %cst_160 {dimension_numbers = #tpu.dot_dimension_numbers<[1], [0], [0], [1], [0, 0, 1, 1], [], []>} : vector<8x512xbf16>, vector<512x128xbf16>, vector<8x128xf32> -> vector<8x128xf32>
    %173 = arith.truncf %172 : vector<8x128xf32> to vector<8x128xbf16>
    %c0_161 = arith.constant 0 : index
    %c0_162 = arith.constant 0 : index
    %c0_163 = arith.constant 0 : index
    %174 = vector.load %arg7[%c0_161, %c0_162, %c0_163] : memref<1x8x128xbf16, #tpu.memory_space<vmem>>, vector<1x8x128xbf16>
    %175 = vector.shape_cast %174 : vector<1x8x128xbf16> to vector<8x128xbf16>
    %176 = vector.shape_cast %173 : vector<8x128xbf16> to vector<1x8x128xbf16>
    tpu.vector_store %arg7[%c0_161, %c0_162, %c0_163], %176 {strides = array<i32>} : memref<1x8x128xbf16, #tpu.memory_space<vmem>>, vector<1x8x128xbf16>,
    return
  }
  func.func @transform_0(%arg0: i32) -> (i32, i32, i32) {
    %c0_i32 = arith.constant 0 : i32
    %c0_i32_0 = arith.constant 0 : i32
    %c0_i32_1 = arith.constant 0 : i32
    return %arg0, %c0_i32, %c0_i32_0 : i32, i32, i32
  }
  func.func @transform_1(%arg0: i32) -> (i32, i32, i32) {
    %c0_i32 = arith.constant 0 : i32
    %c0_i32_0 = arith.constant 0 : i32
    %c0_i32_1 = arith.constant 0 : i32
    %c0_i32_2 = arith.constant 0 : i32
    return %c0_i32, %c0_i32_0, %c0_i32_1 : i32, i32, i32
  }
  func.func @transform_2(%arg0: i32) -> (i32, i32, i32) {
    %c0_i32 = arith.constant 0 : i32
    %c0_i32_0 = arith.constant 0 : i32
    %c0_i32_1 = arith.constant 0 : i32
    %c0_i32_2 = arith.constant 0 : i32
    return %c0_i32, %c0_i32_0, %c0_i32_1 : i32, i32, i32
  }
  func.func @transform_3(%arg0: i32) -> (i32, i32, i32) {
    %c0_i32 = arith.constant 0 : i32
    %c0_i32_0 = arith.constant 0 : i32
    %c0_i32_1 = arith.constant 0 : i32
    %c0_i32_2 = arith.constant 0 : i32
    return %c0_i32, %c0_i32_0, %c0_i32_1 : i32, i32, i32
  }
  func.func @transform_4(%arg0: i32) -> (i32, i32) {
    %c0_i32 = arith.constant 0 : i32
    %c0_i32_0 = arith.constant 0 : i32
    %c0_i32_1 = arith.constant 0 : i32
    return %c0_i32, %c0_i32_0 : i32, i32
  }
  func.func @transform_5(%arg0: i32) -> (i32, i32) {
    %c0_i32 = arith.constant 0 : i32
    %c0_i32_0 = arith.constant 0 : i32
    %c0_i32_1 = arith.constant 0 : i32
    return %c0_i32, %c0_i32_0 : i32, i32
  }
  func.func @transform_6(%arg0: i32) -> (i32, i32, i32) {
    %c0_i32 = arith.constant 0 : i32
    %c0_i32_0 = arith.constant 0 : i32
    %c0_i32_1 = arith.constant 0 : i32
    return %arg0, %c0_i32, %c0_i32_0 : i32, i32, i32
  }
}

</mosaic_0001>

<bundles_post_ra>
// kernel: tpu_custom_call.1
= control target key start
LH: loop header
LB: loop body
LE: loop exit
PB: predicated region body
PF: predicated region fallthrough
CT: control target
= control target key end

     0   :  { %11 = vsyncpa [#allocation5], 0  ;;  %s5932_s0 = inlined_call_operand.vmem [shape: bf16[2,4,512], index: 0, kind: input, shape index: {}]   ;;  %s5933_s1 = inlined_call_operand.vmem [shape: bf16[9,4,4], index: 1, kind: input, shape index: {}]   ;;  %s5934_s2 = inlined_call_operand.vmem [shape: bf16[9,8,4], index: 2, kind: input, shape index: {}]   ;;  %s5935_s3 = inlined_call_operand.vmem [shape: bf16[9,1,512], index: 3, kind: input, shape index: {}]   ;;  %s5936_s4 = inlined_call_operand.vmem [shape: bf16[8,4], index: 4, kind: input, shape index: {}]   ;;  %s5937_s5 = inlined_call_operand.hbm [shape: bf16[512,128], index: 5, kind: input, shape index: {}]   ;;  %s5938_s6 = inlined_call_operand.hbm [shape: bf16[2,8,128], index: 6, kind: output, shape index: {}]  }
   0x1   :  { %12 = vsyncpa [#allocation6], 0 }
   0x2   :  { %14 = vsyncpa [#allocation6 + $0x1], 0  ;;  %s5192_s21 = smov 0   ;;  %s5194_s22 = smov 0  }
   0x3   :  { %s5196_s23 = smov 0   ;;  %s5198_s24 = smov 0  }
   0x4 LB: > { %s5213_s25 = sadd.s32 4294967295, %s5140_s24   ;;  %s4738_s26 = sadd.s32 4294967294, %s5140_s24   ;;  %s5140_s24 = sphi %s5198_s24, %s5946_s24   ;;  %s5136_s23 = sphi %s5196_s23, %s5945_s23   ;;  %s5132_s22 = sphi %s5194_s22, %s5944_s22   ;;  %s5128_s21 = sphi %s5192_s21, %s5943_s21  }
   0x5   : > { %s5217_s27 = sadd.s32 1, %s5140_s24   ;;  %s158_s28 = sadd.s32 1, %s5136_s23 }
   0x6   : > { %s155_s29 = ssub.s32 %s5140_s24, %s5217_s27  ;;  %p168_p0 = scmp.ne.s32.totalorder %s5136_s23, %s5132_s22 }
   0x7   : > { %p156_p1 = scmp.eq.s32.totalorder %s155_s29, 0  ;;  %p169_p2 = scmp.eq.s32.totalorder %s5213_s25, 1 }
   0x8   : > { %p174_p3 = scmp.ne.s32.totalorder %s5132_s22, %s5128_s21  ;;  %p175_p4 = scmp.eq.s32.totalorder %s4738_s26, 1 }
   0x9   : > { %s5228_s30 = scalar_select %p156_p1, %s5136_s23, %s158_s28  }
   0xa   : > { %p5230_p5 = por %p169_p2, %p168_p0  ;;  %p5234_p6 = por %p175_p4, %p174_p3 }
   0xb   : > { %p4739_p7 = scmp.ge.s32.totalorder %s5140_s24, 1  ;;  %p182_p8 = scmp.lt.s32.totalorder %s5140_s24, 3 }
   0xc   : > { %s5940_s8 = scalar_select %p5234_p6, 1, 0 }
   0xd   : > { %p4966_p9 = scmp.eq.s32.totalorder %s5213_s25, 0  ;;  %p5241_p10 = pnand %p4739_p7, %p182_p8 }
   0xe   : > { %s5142_s10 = smov [#allocation4]  }
   0xf   : > { %s206_s11 = sshll.u32 %s5142_s10, 4  ;;  %p4958_p11 = pneg %p5241_p10  ;;  %s207_s11 = int_to_ptr.vmem [resolvable:$true] %s206_s11 }
  0x10   : > { %s5061_s12 = scalar_lea.vmem %s207_s11, 4096  ;;  %p5069_p3 = scmp.lt.s32.totalorder %s207_s11, %s207_s11 }
  0x11   : > { %p4959_p12 = pnand %p4966_p9, %p4958_p11  ;;  %p5062_p0 = scmp.ne.s32.totalorder %s207_s11, %s5061_s12 }
  0x12   : > { %p5070_p4 = scmp.lt.s32.totalorder %s5061_s12, %s5061_s12 }
  0x13   : > { %p5052_p13 = pneg %p4959_p12 }
  0x14   : > { %p5071_p6 = por %p5070_p4, %p5069_p3 }
  0x15   : > { %p5064_p1 = pnand %p5062_p0, %p5052_p13 }
  0x17   : > { %p5065_p2 = pneg %p5064_p1 }
  0x19   : > { %p5072_p7 = pnand %p5071_p6, %p5065_p2 }
  0x1b   : > { %5075 = shalt.err (!%p5072_p7)
}
  0x1c   : > { %s5143_s13 = smov 64   ;;  %s5144_s14 = smov 4  }
  0x1d   : > { %4961 = dma.hbm_to_vmem [thread:$0]  (!%p4959_p12), %s5937_s5, 4096, %s207_s11, [#allocation5], %s5143_s13, %s5143_s13, %s5144_s14  }
  0x1e   : > { %230 = sbr.rel (%p5241_p10) target bundleno = 1215 (0x4bf), region = 44 }
  0x23   : > { %5119 = dma.done.wait (%p4966_p9), [#allocation5], 4096  }
  0x24   : > { %5121 = vsyncadd (%p4966_p9), [#allocation5], 4294963200  ;;  %v288_v0 = vlaneseq  ;;  %v5145_v1 = vmov 1966171168   ;;  %v5146_v3 = vmov 1983009808  }
  0x25   : > { %v286_v2 = vunpack.c.l.s4 %v5145_v1  ;;  %v336_v4 = vunpack.c.l.s4 %v5146_v3  ;;  %v5147_v6 = vmov 0   ;;  %v4749_v11 = vld.sshfl [vmem:[%s5935_s3 + $0x4] sm:$0x33 pattern:$0x75316420]  ;;  %p260_p6 = scmp.lt.s32.totalorder %s5213_s25, 1 }
  0x26   : > { %v289_v5 = vshrl.u32 %v288_v0, 7  ;;  %266 = vst [vmem:[#allocation2] sm:$0x3] %v5147_v6  ;;  %267 = vst [vmem:[#allocation2 + $0xa] sm:$0x3] %v5147_v6  ;;  %537 = vmatprep.mubr.bf16.mxu0 %v5147_v6  ;;  %578 = vmatprep.mubr.bf16.mxu1 %v5147_v6  ;;  %v370_v12 = vcombine.high %v4749_v11, %v4749_v11  ;;  %s5148_s15 = smov 112  }
  0x27   : > { %268 = vst [vmem:[#allocation3] sm:$0x3] %v5147_v6  ;;  %269 = vst [vmem:[#allocation3 + $0xa] sm:$0x3] %v5147_v6  ;;  %v287_v7 = vunpack.c.0.s8 %v286_v2  ;;  %v337_v9 = vunpack.c.0.s8 %v336_v4  ;;  %s5293_s29 = scalar_select %p260_p6, %s5213_s25, 1  ;;  %vm439_vm0 = vcmask 916480  }
  0x28   : > { %v5266_v10 = vsub.s32 0, %v289_v5  ;;  %v4747_v14 = vld.sshfl [vmem:[%s5935_s3] sm:$0x33 pattern:$0x75316420]  ;;  %s5149_s18 = smov 111  }
  0x29   : > { %v5264_v8 = vsub.s32 %v287_v7, %v289_v5  ;;  %v5275_v15 = vsub.s32 %v337_v9, %v289_v5  ;;  %v284_v16 = vcombine.high %v4747_v14, %v4747_v14  ;;  %v4760_v18 = vld.sshfl [vmem:[%s5935_s3 + $0x8] sm:$0x33 pattern:$0x75316420]  ;;  %s5150_s19 = smov 113   ;;  %s4907_s20 = sshll.u32 %s5293_s29, 3 }
  0x2a   : > { %v737_v22 = vcombine.high %v4760_v18, %v4760_v18  ;;  %v4767_v43 = vld.sshfl [vmem:[%s5935_s3 + $0xc] sm:$0x33 pattern:$0x75316420]  ;;  %s5358_s10 = scalar_lea.vmem %s5932_s0, %s4907_s20  ;;  %s5151_s11 = smov 127   ;;  %vm353_vm1 = vcmask 908288  }
  0x2b   : > { %v377_v13 = vrot.slane %v4749_v11, %v5264_v8  ;;  %v291_v17 = vrot.slane %v4747_v14, %v5264_v8  ;;  %v384_v19 = vrot.slane %v370_v12, %v5264_v8  ;;  %v298_v23 = vrot.slane %v284_v16, %v5264_v8  ;;  %v4779_v48 = vld.sshfl [vmem:[%s5935_s3 + $0x14] sm:$0x33 pattern:$0x75316420]  ;;  %s5152_s12 = smov 1   ;;  %s5153_s13 = smov 15  }
  0x2c   : > { %v744_v26 = vrot.slane %v4760_v18, %v5264_v8  ;;  %v751_v38 = vrot.slane %v737_v22, %v5264_v8  ;;  %v968_v63 = vcombine.high %v4767_v43, %v4767_v43  ;;  %v975_v0 = vrot.slane %v4767_v43, %v5264_v8  ;;  %s5154_s14 = smov 16   ;;  %s5155_s16 = smov 17  }
  0x2d   : > { %v385_v20 = vcombine.high %v377_v13, %v377_v13  ;;  %v388_v21 = vpack.i.b16 %v377_v13, %v377_v13  ;;  %v299_v24 = vcombine.high %v291_v17, %v291_v17  ;;  %v302_v25 = vpack.i.b16 %v291_v17, %v291_v17  ;;  %v4786_v17 = vld.sshfl [vmem:[%s5935_s3 + $0x18] sm:$0x33 pattern:$0x75316420] }
  0x2e   : > { %v386_v27 = vcombine.high %v384_v19, %v384_v19  ;;  %v395_v29 = vpack.i.b16 %v384_v19, %v384_v19  ;;  %v300_v31 = vcombine.high %v298_v23, %v298_v23  ;;  %v309_v33 = vpack.i.b16 %v298_v23, %v298_v23 }
  0x2f   : > { %v393_v28 = vrot.slane %v388_v21, %v5266_v10  ;;  %v402_v30 = vpack.i.b16 %v385_v20, %v385_v20  ;;  %v307_v32 = vrot.slane %v302_v25, %v5266_v10  ;;  %v316_v34 = vpack.i.b16 %v299_v24, %v299_v24 }
  0x30   : > { %v400_v35 = vrot.slane %v395_v29, %v5266_v10  ;;  %v409_v37 = vpack.i.b16 %v386_v27, %v386_v27  ;;  %v314_v39 = vrot.slane %v309_v33, %v5266_v10  ;;  %v323_v41 = vpack.i.b16 %v300_v31, %v300_v31 }
  0x31   : > { %v407_v36 = vrot.slane %v402_v30, %v5266_v10  ;;  %v321_v40 = vrot.slane %v316_v34, %v5266_v10  ;;  %v752_v42 = vcombine.high %v744_v26, %v744_v26  ;;  %v753_v46 = vcombine.high %v751_v38, %v751_v38 }
  0x32   : > { %v414_v44 = vrot.slane %v409_v37, %v5266_v10  ;;  %v419_v45 = vcombine.low %v393_v28, %v400_v35  ;;  %v755_v47 = vpack.i.b16 %v744_v26, %v744_v26  ;;  %v328_v49 = vrot.slane %v323_v41, %v5266_v10  ;;  %v4793_v26 = vld.sshfl [vmem:[%s5935_s3 + $0x1c] sm:$0x33 pattern:$0x75316420] }
  0x33   : > { %v333_v50 = vcombine.low %v307_v32, %v314_v39  ;;  %v762_v51 = vpack.i.b16 %v751_v38, %v751_v38  ;;  %v769_v52 = vpack.i.b16 %v752_v42, %v752_v42  ;;  %v776_v56 = vpack.i.b16 %v753_v46, %v753_v46 }
  0x34   : > { %v420_v53 = vcombine.low %v407_v36, %v414_v44  ;;  %v427_v54 = vrot.slane %v419_v45, %v5275_v15  ;;  %v760_v55 = vrot.slane %v755_v47, %v5266_v10  ;;  %v334_v57 = vcombine.low %v321_v40, %v328_v49 }
  0x35   : > { %v341_v58 = vrot.slane %v333_v50, %v5275_v15  ;;  %v767_v59 = vrot.slane %v762_v51, %v5266_v10  ;;  %v774_v60 = vrot.slane %v769_v52, %v5266_v10  ;;  %v781_v62 = vrot.slane %v776_v56, %v5266_v10 }
  0x36   : > { %v434_v61 = vrot.slane %v420_v53, %v5275_v15  ;;  %v348_v1 = vrot.slane %v334_v57, %v5275_v15  ;;  %v1321_v3 = vcombine.high %v4779_v48, %v4779_v48  ;;  %v1328_v4 = vrot.slane %v4779_v48, %v5264_v8 }
  0x37   : > { %v786_v2 = vcombine.low %v760_v55, %v767_v59  ;;  %v787_v7 = vcombine.low %v774_v60, %v781_v62  ;;  %v982_v9 = vrot.slane %v968_v63, %v5264_v8  ;;  %v983_v11 = vcombine.high %v975_v0, %v975_v0 }
  0x38   : > { %v435_v5 = vcombine.low %v427_v54, %v434_v61  ;;  %v5316_v12 = vcombine.low %v341_v58, %v348_v1  ;;  %v986_v14 = vpack.i.b16 %v975_v0, %v975_v0  ;;  %v1335_v16 = vrot.slane %v1321_v3, %v5264_v8  ;;  %v4800_v54 = vld.sshfl [vmem:[%s5935_s3 + $0x20] sm:$0x33 pattern:$0x75316420] }
  0x39   : > { %v794_v13 = vrot.slane %v786_v2, %v5275_v15  ;;  %v801_v18 = vrot.slane %v787_v7, %v5275_v15  ;;  %v984_v19 = vcombine.high %v982_v9, %v982_v9  ;;  %v993_v20 = vpack.i.b16 %v982_v9, %v982_v9 }
  0x3a   : > { %436 = vrot.lane.b32.xlu0 %v435_v5, %s5148_s15  ;;  %v1000_v21 = vpack.i.b16 %v983_v11, %v983_v11  ;;  %v991_v22 = vrot.slane %v986_v14, %v5266_v10  ;;  %v1336_v23 = vcombine.high %v1328_v4, %v1328_v4  ;;  %v1337_v24 = vcombine.high %v1335_v16, %v1335_v16 }
  0x3b   : > { %v1339_v25 = vpack.i.b16 %v1328_v4, %v1328_v4  ;;  %v802_v27 = vcombine.low %v794_v13, %v801_v18  ;;  %v998_v28 = vrot.slane %v993_v20, %v5266_v10  ;;  %v1007_v30 = vpack.i.b16 %v984_v19, %v984_v19 }
  0x3c   : > { %v1005_v29 = vrot.slane %v1000_v21, %v5266_v10  ;;  %v1346_v32 = vpack.i.b16 %v1335_v16, %v1335_v16  ;;  %v1353_v33 = vpack.i.b16 %v1336_v23, %v1336_v23  ;;  %v1360_v34 = vpack.i.b16 %v1337_v24, %v1337_v24  ;;  %v270_v16 = vld [vmem:[%s5358_s10] sm:$0xff] }
  0x3d   : > { %v1344_v31 = vrot.slane %v1339_v25, %v5266_v10  ;;  %803 = vrot.lane.b32.xlu1 %v802_v27, %s5150_s19  ;;  %v1012_v35 = vrot.slane %v1007_v30, %v5266_v10  ;;  %v1017_v36 = vcombine.low %v991_v22, %v998_v28  ;;  %v1550_v37 = vcombine.high %v4786_v17, %v4786_v17 }
  0x3e   : > { %350 = vrot.lane.b32.xlu0 %v5316_v12, %s5149_s18  ;;  %v1351_v38 = vrot.slane %v1346_v32, %v5266_v10  ;;  %v1358_v39 = vrot.slane %v1353_v33, %v5266_v10  ;;  %v1365_v40 = vrot.slane %v1360_v34, %v5266_v10  ;;  %v1557_v41 = vrot.slane %v4786_v17, %v5264_v8 }
  0x3f   : > { %v1018_v42 = vcombine.low %v1005_v29, %v1012_v35  ;;  %v1025_v43 = vrot.slane %v1017_v36, %v5275_v15  ;;  %v1564_v44 = vrot.slane %v1550_v37, %v5264_v8  ;;  %v1779_v45 = vcombine.high %v4793_v26, %v4793_v26 }
  0x40   : > { %v1370_v46 = vcombine.low %v1344_v31, %v1351_v38  ;;  %v1371_v47 = vcombine.low %v1358_v39, %v1365_v40  ;;  %v1565_v48 = vcombine.high %v1557_v41, %v1557_v41  ;;  %v1568_v49 = vpack.i.b16 %v1557_v41, %v1557_v41 }
  0x41   : > { %v1032_v50 = vrot.slane %v1018_v42, %v5275_v15  ;;  %v1566_v51 = vcombine.high %v1564_v44, %v1564_v44  ;;  %v1575_v52 = vpack.i.b16 %v1564_v44, %v1564_v44  ;;  %v1786_v53 = vrot.slane %v4793_v26, %v5264_v8 }
  0x42   : > { %v1378_v55 = vrot.slane %v1370_v46, %v5275_v15  ;;  %v1385_v56 = vrot.slane %v1371_v47, %v5275_v15  ;;  %v1573_v57 = vrot.slane %v1568_v49, %v5266_v10  ;;  %v1582_v58 = vpack.i.b16 %v1565_v48, %v1565_v48 }
  0x43   : > { %v5351_v59 = vcombine.low %v1025_v43, %v1032_v50  ;;  %v1580_v60 = vrot.slane %v1575_v52, %v5266_v10  ;;  %v1589_v61 = vpack.i.b16 %v1566_v51, %v1566_v51  ;;  %v1793_v62 = vrot.slane %v1779_v45, %v5264_v8 }
  0x44   : > { %v1386_v63 = vcombine.low %v1378_v55, %v1385_v56  ;;  %v1587_v0 = vrot.slane %v1582_v58, %v5266_v10  ;;  %v1794_v1 = vcombine.high %v1786_v53, %v1786_v53  ;;  %v1797_v2 = vpack.i.b16 %v1786_v53, %v1786_v53 }
  0x45   : > { %1034 = vrot.lane.b32.xlu1 %v5351_v59, %s5151_s11  ;;  %v1594_v3 = vrot.slane %v1589_v61, %v5266_v10  ;;  %v1599_v4 = vcombine.low %v1573_v57, %v1580_v60  ;;  %v1795_v5 = vcombine.high %v1793_v62, %v1793_v62  ;;  %v1804_v7 = vpack.i.b16 %v1793_v62, %v1793_v62 }
  0x46   : > { %1387 = vrot.lane.b32.xlu0 %v1386_v63, %s5152_s12  ;;  %v1802_v9 = vrot.slane %v1797_v2, %v5266_v10  ;;  %v1811_v11 = vpack.i.b16 %v1794_v1, %v1794_v1  ;;  %v2008_v13 = vcombine.high %v4800_v54, %v4800_v54  ;;  %v2015_v14 = vrot.slane %v4800_v54, %v5264_v8 }
  0x47   : > { %v1600_v17 = vcombine.low %v1587_v0, %v1594_v3  ;;  %v1607_v18 = vrot.slane %v1599_v4, %v5275_v15  ;;  %v1809_v19 = vrot.slane %v1804_v7, %v5266_v10  ;;  %v1818_v20 = vpack.i.b16 %v1795_v5, %v1795_v5 }
  0x48   : > { %v1816_v21 = vrot.slane %v1811_v11, %v5266_v10  ;;  %v2022_v22 = vrot.slane %v2008_v13, %v5264_v8  ;;  %v2023_v23 = vcombine.high %v2015_v14, %v2015_v14  ;;  %v2026_v24 = vpack.i.b16 %v2015_v14, %v2015_v14 }
  0x49   : > { %v1614_v25 = vrot.slane %v1600_v17, %v5275_v15  ;;  %v1823_v26 = vrot.slane %v1818_v20, %v5266_v10  ;;  %v1828_v27 = vcombine.low %v1802_v9, %v1809_v19  ;;  %v5375_v28 = vmax.bf16 %v5147_v6, %v270_v16 }
  0x4a   : > { %v2024_v29 = vcombine.high %v2022_v22, %v2022_v22  ;;  %v2031_v30 = vrot.slane %v2026_v24, %v5266_v10  ;;  %v2033_v31 = vpack.i.b16 %v2022_v22, %v2022_v22  ;;  %v2040_v32 = vpack.i.b16 %v2023_v23, %v2023_v23 }
  0x4b   : > { %v5378_v33 = vcombine.low %v1607_v18, %v1614_v25  ;;  %v1829_v34 = vcombine.low %v1816_v21, %v1823_v26  ;;  %v1836_v35 = vrot.slane %v1828_v27, %v5275_v15  ;;  %272 = vst [vmem:[#allocation2 + $0x2] sm:$0xff] %v5375_v28  ;;  %vm806_vm2 = vcmask 924672  }
  0x4c   : > { %v2038_v36 = vrot.slane %v2033_v31, %v5266_v10  ;;  %v2045_v37 = vrot.slane %v2040_v32, %v5266_v10  ;;  %v2047_v38 = vpack.i.b16 %v2024_v29, %v2024_v29  ;;  %vm1037_vm3 = vcmask 1039360  }
  0x4d   : > { %1616 = vrot.lane.b32.xlu1 %v5378_v33, %s5153_s13  ;;  %v1843_v39 = vrot.slane %v1829_v34, %v5275_v15  ;;  %vm1081_vm4 = vcmask 7168   ;;  %vm850_vm5 = vcmask 121856   ;;  %vm483_vm6 = vcmask 130048  }
  0x4e   : > { %v2052_v40 = vrot.slane %v2047_v38, %v5266_v10  ;;  %v2057_v41 = vcombine.low %v2031_v30, %v2038_v36  ;;  %vm623_vm7 = vcmask 138240   ;;  %vm492_vm8 = vcmask 1041408  }
  0x4f   : > { %v1844_v42 = vcombine.low %v1836_v35, %v1843_v39  ;;  %vm488_vm9 = vcmask 31744  }
  0x50   : > { %v2058_v43 = vcombine.low %v2045_v37, %v2052_v40  ;;  %v2065_v44 = vrot.slane %v2057_v41, %v5275_v15 }
  0x51   : > { %1845 = vrot.lane.b32.xlu0 %v1844_v42, %s5154_s14 }
  0x52   : > { %v2072_v45 = vrot.slane %v2058_v43, %v5275_v15  ;;  %v274_v48 = vld [vmem:[#allocation2 + $0x8] sm:$0x3]  ;;  %v273_v50 = vld [vmem:[#allocation2] sm:$0xff] }
  0x53   : > { %v726_v20 = vld [vmem:[#allocation2 + $0x8] sm:$0x3] }
  0x54   : > { %v5391_v46 = vcombine.low %v2065_v44, %v2072_v45  ;;  %v957_v38 = vld [vmem:[#allocation2 + $0x8] sm:$0x3] }
  0x56   : > { %2074 = vrot.lane.b32.xlu1 %v5391_v46, %s5155_s16 }
  0xac   : > { %v437_v47 = vpop.permute.xlu0 %436 }
  0xad   : > { %v438_v49 = vrot.slane %v437_v47, 6 }
  0xaf   : > { %v440_v51 = vsel %vm439_vm0, %v438_v49, %v437_v47  ;;  %v444_v52 = vmul.bf16 %v438_v49, %v274_v48  ;;  %v804_v57 = vpop.permute.xlu1 %803 }
  0xb0   : > { %v351_v53 = vpop.permute.xlu0 %350  ;;  %v443_v54 = vmul.bf16 %v440_v51, %v273_v50  ;;  %v805_v61 = vrot.slane %v804_v57, 6 }
  0xb1   : > { %v352_v55 = vrot.slane %v351_v53, 6  ;;  %v472_v56 = vrot.slane %v444_v52, %v5275_v15 }
  0xb2   : > { %v449_v62 = vcombine.high %v443_v54, %v443_v54  ;;  %v456_v63 = vrot.slane %v443_v54, %v5275_v15  ;;  %v807_v1 = vsel %vm806_vm2, %v805_v61, %v804_v57  ;;  %v811_v23 = vmul.bf16 %v805_v61, %v726_v20 }
  0xb3   : > { %v354_v58 = vsel %vm353_vm1, %v352_v55, %v351_v53  ;;  %481 = vrot.lane.b32.xlu0 %v472_v56, %s5154_s14  ;;  %v810_v5 = vmul.bf16 %v807_v1, %v273_v50  ;;  %v358_v14 = vmul.bf16 %v352_v55, %v274_v48  ;;  %v1310_v48 = vld [vmem:[#allocation2 + $0xa] sm:$0x3] }
  0xb4   : > { %v357_v60 = vmul.bf16 %v354_v58, %v273_v50  ;;  %v463_v2 = vrot.slane %v449_v62, %v5275_v15  ;;  %v464_v4 = vcombine.high %v456_v63, %v456_v63  ;;  %v839_v31 = vrot.slane %v811_v23, %v5275_v15  ;;  %v1997_v23 = vld [vmem:[#allocation2 + $0xa] sm:$0x3] }
  0xb5   : > { %v823_v11 = vrot.slane %v810_v5, %v5275_v15  ;;  %v816_v18 = vcombine.high %v810_v5, %v810_v5  ;;  %v612_v22 = vrot.slane %v358_v14, %v5275_v15 }
  0xb6   : > { %v596_v0 = vrot.slane %v357_v60, %v5275_v15  ;;  %v589_v3 = vcombine.high %v357_v60, %v357_v60  ;;  %v465_v16 = vcombine.high %v463_v2, %v463_v2 }
  0xb7   : > { %473 = vrot.lane.b32.xlu0 %v456_v63, %s5154_s14  ;;  %v1035_v13 = vpop.permute.xlu1 %1034  ;;  %v830_v25 = vrot.slane %v816_v18, %v5275_v15  ;;  %v831_v27 = vcombine.high %v823_v11, %v823_v11 }
  0xb8   : > { %613 = vrot.lane.b32.xlu1 %v596_v0, %s5155_s16  ;;  %v604_v7 = vcombine.high %v596_v0, %v596_v0  ;;  %v603_v9 = vrot.slane %v589_v3, %v5275_v15  ;;  %v1036_v17 = vrot.slane %v1035_v13, 6  ;;  %v1388_v26 = vpop.permute.xlu0 %1387  ;;  %v1539_v0 = vld [vmem:[#allocation2 + $0xa] sm:$0x3] }
  0xb9   : > { %v1389_v29 = vrot.slane %v1388_v26, 6  ;;  %v832_v37 = vcombine.high %v830_v25, %v830_v25 }
  0xba   : > { %v605_v19 = vcombine.high %v603_v9, %v603_v9  ;;  %v1038_v21 = vsel %vm1037_vm3, %v1036_v17, %v1035_v13  ;;  %v1042_v42 = vmul.bf16 %v1036_v17, %v957_v38  ;;  %v4840_v38 = vld.sshfl [vmem:[%s5935_s3 + $0x14] sm:$0x33 pattern:$0x75316420] }
  0xbb   : > { %477 = vrot.lane.b32.xlu0 %v463_v2, %s5154_s14  ;;  %v1041_v24 = vmul.bf16 %v1038_v21, %v273_v50  ;;  %v1390_v34 = vsel %vm1081_vm4, %v1389_v29, %v1388_v26  ;;  %v1394_v53 = vmul.bf16 %v1389_v29, %v1310_v48  ;;  %v4810_v29 = vld.sshfl [vmem:[%s5935_s3 + $0x4] sm:$0x33 pattern:$0x75316420] }
  0xbc   : > { %475 = vrot.lane.b32.xlu1 %v464_v4, %s5154_s14  ;;  %v1393_v39 = vmul.bf16 %v1390_v34, %v5375_v28  ;;  %v1070_v50 = vrot.slane %v1042_v42, %v5275_v15  ;;  %v4821_v34 = vld.sshfl [vmem:[%s5935_s3 + $0x8] sm:$0x33 pattern:$0x75316420]  ;;  %v3290_v42 = vcombine.high %v4840_v38, %v4840_v38 }
  0xbd   : > { %v1047_v30 = vcombine.high %v1041_v24, %v1041_v24  ;;  %v1054_v32 = vrot.slane %v1041_v24, %v5275_v15  ;;  %v1422_v57 = vrot.slane %v1394_v53, %v5275_v15 }
  0xbe   : > { %v1399_v44 = vcombine.high %v1393_v39, %v1393_v39  ;;  %v1406_v45 = vrot.slane %v1393_v39, %v5275_v15 }
  0xbf   : > { %615 = vrot.lane.b32.xlu0 %v604_v7, %s5155_s16  ;;  %v1062_v35 = vcombine.high %v1054_v32, %v1054_v32  ;;  %v1061_v36 = vrot.slane %v1047_v30, %v5275_v15  ;;  %v1617_v40 = vpop.permute.xlu1 %1616 }
  0xc0   : > { %617 = vrot.lane.b32.xlu1 %v603_v9, %s5155_s16  ;;  %v1618_v43 = vrot.slane %v1617_v40, 6  ;;  %v1413_v51 = vrot.slane %v1399_v44, %v5275_v15  ;;  %v1414_v55 = vcombine.high %v1406_v45, %v1406_v45 }
  0xc1   : > { %v1063_v41 = vcombine.high %v1061_v36, %v1061_v36 }
  0xc2   : > { %v1619_v49 = vsel %vm850_vm5, %v1618_v43, %v1617_v40  ;;  %v1623_v3 = vmul.bf16 %v1618_v43, %v1539_v0  ;;  %v1415_v4 = vcombine.high %v1413_v51, %v1413_v51 }
  0xc3   : > { %840 = vrot.lane.b32.xlu0 %v823_v11, %s5153_s13  ;;  %v1846_v47 = vpop.permute.xlu0 %1845  ;;  %v1622_v54 = vmul.bf16 %v1619_v49, %v5375_v28  ;;  %v1768_v11 = vld [vmem:[#allocation2 + $0xa] sm:$0x3] }
  0xc4   : > { %479 = vrot.lane.b32.xlu1 %v465_v16, %s5154_s14  ;;  %v1847_v52 = vrot.slane %v1846_v47, 6  ;;  %v1651_v14 = vrot.slane %v1623_v3, %v5275_v15 }
  0xc5   : > { %v1635_v58 = vrot.slane %v1622_v54, %v5275_v15  ;;  %v1628_v60 = vcombine.high %v1622_v54, %v1622_v54 }
  0xc6   : > { %v1848_v56 = vsel %vm483_vm6, %v1847_v52, %v1846_v47  ;;  %v1852_v16 = vmul.bf16 %v1847_v52, %v1768_v11  ;;  %v3297_v47 = vrot.slane %v4840_v38, %v5264_v8 }
  0xc7   : > { %619 = vrot.lane.b32.xlu0 %v605_v19, %s5155_s16  ;;  %v1851_v61 = vmul.bf16 %v1848_v56, %v5375_v28  ;;  %v1643_v62 = vcombine.high %v1635_v58, %v1635_v58  ;;  %v1642_v63 = vrot.slane %v1628_v60, %v5275_v15  ;;  %v3304_v60 = vrot.slane %v3290_v42, %v5264_v8 }
  0xc8   : > { %621 = vrot.lane.b32.xlu1 %v612_v22, %s5155_s16  ;;  %v2075_v2 = vpop.permute.xlu1 %2074  ;;  %v1880_v21 = vrot.slane %v1852_v16, %v5275_v15  ;;  %v3305_v0 = vcombine.high %v3297_v47, %v3297_v47 }
  0xc9   : > { %v1864_v1 = vrot.slane %v1851_v61, %v5275_v15  ;;  %v2076_v5 = vrot.slane %v2075_v2, 6  ;;  %v1857_v7 = vcombine.high %v1851_v61, %v1851_v61  ;;  %v1644_v9 = vcombine.high %v1642_v63, %v1642_v63 }
  0xca   : > { %v3306_v3 = vcombine.high %v3304_v60, %v3304_v60  ;;  %v3322_v11 = vpack.i.b16 %v3305_v0, %v3305_v0 }
  0xcb   : > { %844 = vrot.lane.b32.xlu0 %v830_v25, %s5153_s13  ;;  %v2077_v13 = vsel %vm623_vm7, %v2076_v5, %v2075_v2  ;;  %v1871_v18 = vrot.slane %v1857_v7, %v5275_v15  ;;  %v1872_v19 = vcombine.high %v1864_v1, %v1864_v1  ;;  %v2081_v26 = vmul.bf16 %v2076_v5, %v1997_v23 }
  0xcc   : > { %842 = vrot.lane.b32.xlu1 %v831_v27, %s5153_s13  ;;  %v2080_v17 = vmul.bf16 %v2077_v13, %v5375_v28  ;;  %v4854_v13 = vld.sshfl [vmem:[%s5935_s3 + $0x1c] sm:$0x33 pattern:$0x75316420] }
  0xcd   : > { %v1873_v27 = vcombine.high %v1871_v18, %v1871_v18 }
  0xce   : > { %v2086_v20 = vcombine.high %v2080_v17, %v2080_v17  ;;  %v2093_v22 = vrot.slane %v2080_v17, %v5275_v15 }
  0xcf   : > { %848 = vrot.lane.b32.xlu0 %v839_v31, %s5153_s13  ;;  %v2351_v31 = vcombine.high %v4810_v29, %v4810_v29 }
  0xd0   : > { %1071 = vrot.lane.b32.xlu1 %v1054_v32, %s5152_s12  ;;  %v2101_v24 = vcombine.high %v2093_v22, %v2093_v22  ;;  %v2100_v25 = vrot.slane %v2086_v20, %v5275_v15  ;;  %v2358_v32 = vrot.slane %v4810_v29, %v5264_v8 }
  0xd1   : > { %v2365_v39 = vrot.slane %v2351_v31, %v5264_v8 }
  0xd2   : > { %v2102_v30 = vcombine.high %v2100_v25, %v2100_v25  ;;  %v2366_v40 = vcombine.high %v2358_v32, %v2358_v32 }
  0xd3   : > { %1073 = vrot.lane.b32.xlu0 %v1062_v35, %s5152_s12  ;;  %v2109_v35 = vrot.slane %v2081_v26, %v5275_v15  ;;  %v2367_v48 = vcombine.high %v2365_v39, %v2365_v39  ;;  %v3753_v26 = vrot.slane %v4854_v13, %v5264_v8 }
  0xd4   : > { %846 = vrot.lane.b32.xlu1 %v832_v37, %s5153_s13  ;;  %v2719_v37 = vrot.slane %v4821_v34, %v5264_v8 }
  0xd6   : > { %v2727_v44 = vcombine.high %v2719_v37, %v2719_v37 }
  0xd7   : > { %1077 = vrot.lane.b32.xlu0 %v1063_v41, %s5152_s12  ;;  %v2369_v41 = vpack.i.b16 %v2358_v32, %v2358_v32  ;;  %v3761_v32 = vcombine.high %v3753_v26, %v3753_v26 }
  0xd8   : > { %1075 = vrot.lane.b32.xlu1 %v1061_v36, %s5152_s12  ;;  %v2712_v36 = vcombine.high %v4821_v34, %v4821_v34 }
  0xd9   : > { %v2374_v49 = vrot.slane %v2369_v41, %v5266_v10 }
  0xda   : > { %v2726_v43 = vrot.slane %v2712_v36, %v5264_v8  ;;  %v3764_v36 = vpack.i.b16 %v3753_v26, %v3753_v26  ;;  %v1191_v26 = vcombine.high %v5375_v28, %v5375_v28 }
  0xdb   : > { %1423 = vrot.lane.b32.xlu0 %v1406_v45, %s5151_s11  ;;  %v2730_v45 = vpack.i.b16 %v2719_v37, %v2719_v37 }
  0xdc   : > { %1079 = vrot.lane.b32.xlu1 %v1070_v50, %s5152_s12  ;;  %v2376_v50 = vpack.i.b16 %v2365_v39, %v2365_v39  ;;  %v2728_v52 = vcombine.high %v2726_v43, %v2726_v43  ;;  %v2737_v54 = vpack.i.b16 %v2726_v43, %v2726_v43  ;;  %v3769_v41 = vrot.slane %v3764_v36, %v5266_v10 }
  0xdd   : > { %v2735_v53 = vrot.slane %v2730_v45, %v5266_v10 }
  0xde   : > { %v2381_v56 = vrot.slane %v2376_v50, %v5266_v10  ;;  %v2742_v61 = vrot.slane %v2737_v54, %v5266_v10 }
  0xdf   : > { %1427 = vrot.lane.b32.xlu0 %v1413_v51, %s5151_s11  ;;  %v2383_v51 = vpack.i.b16 %v2366_v40, %v2366_v40  ;;  %v3778_v40 = vpack.i.b16 %v3761_v32, %v3761_v32 }
  0xe0   : > { %1425 = vrot.lane.b32.xlu1 %v1414_v55, %s5151_s11  ;;  %v2744_v55 = vpack.i.b16 %v2727_v44, %v2727_v44  ;;  %v2400_v2 = vcombine.low %v2374_v49, %v2381_v56  ;;  %v2761_v7 = vcombine.low %v2735_v53, %v2742_v61 }
  0xe2   : > { %v2408_v16 = vrot.slane %v2400_v2, %v5275_v15  ;;  %v2769_v20 = vrot.slane %v2761_v7, %v5275_v15 }
  0xe3   : > { %1431 = vrot.lane.b32.xlu0 %v1422_v57, %s5151_s11  ;;  %v2388_v57 = vrot.slane %v2383_v51, %v5266_v10 }
  0xe4   : > { %1652 = vrot.lane.b32.xlu1 %v1635_v58, %s5150_s19  ;;  %v2390_v58 = vpack.i.b16 %v2367_v48, %v2367_v48 }
  0xe7   : > { %1654 = vrot.lane.b32.xlu0 %v1643_v62, %s5150_s19  ;;  %v2749_v62 = vrot.slane %v2744_v55, %v5266_v10 }
  0xe8   : > { %1656 = vrot.lane.b32.xlu1 %v1642_v63, %s5150_s19  ;;  %v2751_v63 = vpack.i.b16 %v2728_v52, %v2728_v52 }
  0xea   : > { %v2756_v5 = vrot.slane %v2751_v63, %v5266_v10 }
  0xeb   : > { %1881 = vrot.lane.b32.xlu0 %v1864_v1, %s5148_s15  ;;  %v2395_v1 = vrot.slane %v2390_v58, %v5266_v10 }
  0xec   : > { %1429 = vrot.lane.b32.xlu1 %v1415_v4, %s5151_s11  ;;  %v3308_v4 = vpack.i.b16 %v3297_v47, %v3297_v47 }
  0xee   : > { %v3313_v17 = vrot.slane %v3308_v4, %v5266_v10 }
  0xef   : > { %1658 = vrot.lane.b32.xlu0 %v1644_v9, %s5150_s19  ;;  %v3315_v9 = vpack.i.b16 %v3304_v60, %v3304_v60 }
  0xf0   : > { %1660 = vrot.lane.b32.xlu1 %v1651_v14, %s5150_s19  ;;  %v2401_v14 = vcombine.low %v2388_v57, %v2395_v1  ;;  %v4750_v57 = vld [vmem:[%s5933_s1 + $0x2] sm:$0x3] }
  0xf2   : > { %v2415_v23 = vrot.slane %v2401_v14, %v5275_v15 }
  0xf3   : > { %1885 = vrot.lane.b32.xlu0 %v1871_v18, %s5148_s15  ;;  %v3329_v18 = vpack.i.b16 %v3306_v3, %v3306_v3 }
  0xf4   : > { %1883 = vrot.lane.b32.xlu1 %v1872_v19, %s5148_s15  ;;  %v2762_v19 = vcombine.low %v2749_v62, %v2756_v5  ;;  %v359_v5 = vld [vmem:[%s5933_s1] sm:$0x3] }
  0xf7   : > { %1889 = vrot.lane.b32.xlu0 %v1880_v21, %s5148_s15  ;;  %v3320_v21 = vrot.slane %v3315_v9, %v5266_v10 }
  0xf8   : > { %2110 = vrot.lane.b32.xlu1 %v2093_v22, %s5149_s18  ;;  %v3327_v22 = vrot.slane %v3322_v11, %v5266_v10 }
  0xf9   : > { %v3339_v29 = vcombine.low %v3313_v17, %v3320_v21  ;;  %v4761_v21 = vld [vmem:[%s5933_s1 + $0x4] sm:$0x3] }
  0xfb   : > { %2112 = vrot.lane.b32.xlu0 %v2101_v24, %s5149_s18  ;;  %v3334_v24 = vrot.slane %v3329_v18, %v5266_v10 }
  0xfc   : > { %1887 = vrot.lane.b32.xlu1 %v1873_v27, %s5148_s15  ;;  %v2776_v27 = vrot.slane %v2762_v19, %v5275_v15 }
  0xfd   : > { %v3340_v31 = vcombine.low %v3327_v22, %v3334_v24 }
  0xfe   : > { %v2777_v34 = vcombine.low %v2769_v20, %v2776_v27 }
  0xff   : > { %2116 = vrot.lane.b32.xlu0 %v2102_v30, %s5149_s18  ;;  %v2416_v30 = vcombine.low %v2408_v16, %v2415_v23  ;;  %v3354_v37 = vrot.slane %v3340_v31, %v5275_v15 }
 0x100   : > { %2114 = vrot.lane.b32.xlu1 %v2100_v25, %s5149_s18  ;;  %v3746_v25 = vcombine.high %v4854_v13, %v4854_v13 }
 0x103   : > { %2417 = vrot.lane.b32.xlu0 %v2416_v30, %s5148_s15 }
 0x104   : > { %2118 = vrot.lane.b32.xlu1 %v2109_v35, %s5149_s18  ;;  %v3347_v35 = vrot.slane %v3339_v29, %v5275_v15 }
 0x107   : > { %2778 = vrot.lane.b32.xlu0 %v2777_v34, %s5150_s19 }
 0x108   : > { %2333 = vrot.lane.b32.xlu1 %v5316_v12, %s5149_s18  ;;  %v3760_v12 = vrot.slane %v3746_v25, %v5264_v8  ;;  %v3783_v8 = vrot.slane %v3778_v40, %v5266_v10  ;;  %v1198_v25 = vrot.slane %v5375_v28, %v5275_v15 }
 0x10a   : > { %v3762_v38 = vcombine.high %v3760_v12, %v3760_v12  ;;  %v3771_v39 = vpack.i.b16 %v3760_v12, %v3760_v12  ;;  %v1206_v34 = vcombine.high %v1198_v25, %v1198_v25 }
 0x10c   : > { %3006 = vrot.lane.b32.xlu1 %v5351_v59, %s5151_s11  ;;  %v3776_v42 = vrot.slane %v3771_v39, %v5266_v10  ;;  %v3785_v43 = vpack.i.b16 %v3762_v38, %v3762_v38  ;;  %v3355_v59 = vcombine.low %v3347_v35, %v3354_v37  ;;  %v1205_v35 = vrot.slane %v1191_v26, %v5275_v15  ;;  %v4768_v39 = vld [vmem:[%s5933_s1 + $0x6] sm:$0x3] }
 0x10e   : > { %v3790_v44 = vrot.slane %v3785_v43, %v5266_v10  ;;  %v3795_v45 = vcombine.low %v3769_v41, %v3776_v42  ;;  %3356 = vrot.lane.b32.xlu0 %v3355_v59, %s5152_s12  ;;  %v1212_v41 = vsel %vm492_vm8, %v1198_v25, 0  ;;  %v1207_v42 = vcombine.high %v1205_v35, %v1205_v35 }
 0x110   : > { %3584 = vrot.lane.b32.xlu1 %v5378_v33, %s5153_s13  ;;  %v3796_v47 = vcombine.low %v3783_v8, %v3790_v44  ;;  %v3803_v48 = vrot.slane %v3795_v45, %v5275_v15  ;;  %v1218_v45 = vsel %vm492_vm8, %v1205_v35, 0 }
 0x112   : > { %v3810_v49 = vrot.slane %v3796_v47, %v5275_v15 }
 0x114   : > { %4040 = vrot.lane.b32.xlu1 %v5391_v46, %s5155_s16  ;;  %v3811_v50 = vcombine.low %v3803_v48, %v3810_v49 }
 0x116   : > { %3812 = vrot.lane.b32.xlu0 %v3811_v50, %s5154_s14  ;;  %v4773_v50 = vld [vmem:[%s5933_s1 + $0x8] sm:$0x3] }
 0x125   : > { %v482_v33 = vpop.permute.xlu0 %481 }
 0x129   : > { %v474_v51 = vpop.permute.xlu0 %473 }
 0x12a   : > { %v614_v52 = vpop.permute.xlu1 %613 }
 0x12d   : > { %v478_v53 = vpop.permute.xlu0 %477 }
 0x12e   : > { %v476_v10 = vpop.permute.xlu1 %475 }
 0x12f   : > { %v485_v54 = vsel %vm483_vm6, %v476_v10, %v478_v53  ;;  %v484_v55 = vsel %vm483_vm6, %v474_v51, %v476_v10 }
 0x130   : > { %4751 = vmatprep.subr.msk.bf16.mxu0 %vm492_vm8, %v485_v54  ;;  %v494_v46 = vsel %vm492_vm8, %v484_v55, 0 }
 0x131   : > { %520 = vmatpush1.bf16.msra.mxu0 %v494_v46  ;;  %v616_v56 = vpop.permute.xlu0 %615  ;;  %v4780_v46 = vld [vmem:[%s5933_s1 + $0xa] sm:$0x3] }
 0x132   : > { %v624_v58 = vsel %vm623_vm7, %v614_v52, %v616_v56  ;;  %v618_v60 = vpop.permute.xlu1 %617 }
 0x133   : > { %v632_v61 = vsel %vm492_vm8, %v624_v58, 0  ;;  %v625_v62 = vsel %vm623_vm7, %v616_v56, %v618_v60 }
 0x134   : > { %4752 = vmatmul.mubr.msk.bf16.vlgmr.msra.gmra.mxu0 %vm488_vm9, %v4750_v57  ;;  %4755 = vmatprep.subr.msk.bf16.mxu0 %vm492_vm8, %v625_v62 }
 0x135   : > { %v841_v63 = vpop.permute.xlu0 %840  ;;  %658 = vmatpush1.bf16.msra.mxu0 %v632_v61  ;;  %675 = vmatprep.mubr.bf16.mxu0 %v5147_v6 }
 0x136   : > { %v480_v0 = vpop.permute.xlu1 %479 }
 0x137   : > { %v487_v1 = vsel %vm483_vm6, %v480_v0, %v482_v33  ;;  %v486_v2 = vsel %vm483_vm6, %v478_v53, %v480_v0 }
 0x138   : > { %4753 = vmatprep.subr.msk.bf16.mxu1 %vm492_vm8, %v487_v1  ;;  %v500_v3 = vsel %vm492_vm8, %v486_v2, 0 }
 0x139   : > { %561 = vmatpush1.bf16.msra.mxu1 %v500_v3  ;;  %v620_v4 = vpop.permute.xlu0 %619 }
 0x13a   : > { %v626_v7 = vsel %vm623_vm7, %v618_v60, %v620_v4  ;;  %v622_v9 = vpop.permute.xlu1 %621 }
 0x13b   : > { %v638_v11 = vsel %vm492_vm8, %v626_v7, 0  ;;  %v627_v13 = vsel %vm623_vm7, %v620_v4, %v622_v9  ;;  %v4787_v4 = vld [vmem:[%s5933_s1 + $0xc] sm:$0x3] }
 0x13c   : > { %4754 = vmatmul.mubr.msk.bf16.vlgmr.msra.gmra.mxu1 %vm488_vm9, %v4750_v57  ;;  %4756 = vmatmul.mubr.msk.bf16.vlgmr.msra.gmra.mxu0 %vm488_vm9, %v359_v5 }
 0x13d   : > { %4757 = vmatprep.subr.msk.bf16.mxu1 %vm492_vm8, %v627_v13  ;;  %v845_v14 = vpop.permute.xlu0 %844  ;;  %716 = vmatprep.mubr.bf16.mxu1 %v5147_v6 }
 0x13e   : > { %699 = vmatpush1.bf16.msra.mxu1 %v638_v11  ;;  %v843_v16 = vpop.permute.xlu1 %842  ;;  %902 = vmatprep.mubr.bf16.mxu0 %v5147_v6 }
 0x13f   : > { %v851_v17 = vsel %vm850_vm5, %v841_v63, %v843_v16  ;;  %v852_v18 = vsel %vm850_vm5, %v843_v16, %v845_v14 }
 0x140   : > { %v859_v19 = vsel %vm492_vm8, %v851_v17, 0  ;;  %4762 = vmatprep.subr.msk.bf16.mxu0 %vm492_vm8, %v852_v18  ;;  %v4794_v17 = vld [vmem:[%s5933_s1 + $0xe] sm:$0x3] }
 0x141   : > { %885 = vmatpush1.bf16.msra.mxu0 %v859_v19  ;;  %v849_v20 = vpop.permute.xlu0 %848 }
 0x142   : > { %v1072_v22 = vpop.permute.xlu1 %1071 }
 0x144   : > { %4758 = vmatmul.mubr.msk.bf16.vlgmr.msra.gmra.mxu1 %vm488_vm9, %v359_v5  ;;  %4763 = vmatmul.mubr.msk.bf16.vlgmr.msra.gmra.mxu0 %vm488_vm9, %v4761_v21 }
 0x145   : > { %v1074_v23 = vpop.permute.xlu0 %1073  ;;  %943 = vmatprep.mubr.bf16.mxu1 %v5147_v6  ;;  %1133 = vmatprep.mubr.bf16.mxu0 %v5147_v6 }
 0x146   : > { %v847_v24 = vpop.permute.xlu1 %846  ;;  %v1082_v31 = vsel %vm1081_vm4, %v1072_v22, %v1074_v23 }
 0x147   : > { %v853_v27 = vsel %vm850_vm5, %v845_v14, %v847_v24  ;;  %v854_v29 = vsel %vm850_vm5, %v847_v24, %v849_v20  ;;  %v1090_v28 = vsel %vm492_vm8, %v1082_v31, 0 }
 0x148   : > { %v865_v30 = vsel %vm492_vm8, %v853_v27, 0  ;;  %4764 = vmatprep.subr.msk.bf16.mxu1 %vm492_vm8, %v854_v29  ;;  %v4801_v29 = vld [vmem:[%s5933_s1 + $0x10] sm:$0x3] }
 0x149   : > { %926 = vmatpush1.bf16.msra.mxu1 %v865_v30  ;;  %v1078_v12 = vpop.permute.xlu0 %1077 }
 0x14a   : > { %v1076_v32 = vpop.permute.xlu1 %1075 }
 0x14b   : > { %v1083_v36 = vsel %vm1081_vm4, %v1074_v23, %v1076_v32  ;;  %v1084_v37 = vsel %vm1081_vm4, %v1076_v32, %v1078_v12 }
 0x14c   : > { %4765 = vmatmul.mubr.msk.bf16.vlgmr.msra.gmra.mxu1 %vm488_vm9, %v4761_v21  ;;  %4769 = vmatprep.subr.msk.bf16.mxu0 %vm492_vm8, %v1083_v36  ;;  %v1096_v43 = vsel %vm492_vm8, %v1084_v37, 0 }
 0x14d   : > { %1116 = vmatpush1.bf16.msra.mxu0 %v1090_v28  ;;  %v1424_v38 = vpop.permute.xlu0 %1423  ;;  %1174 = vmatprep.mubr.bf16.mxu1 %v5147_v6 }
 0x14e   : > { %v1080_v40 = vpop.permute.xlu1 %1079  ;;  %4774 = vmatprep.subr.msk.bf16.mxu0 %vm492_vm8, %v1206_v34 }
 0x14f   : > { %v1085_v8 = vsel %vm1081_vm4, %v1078_v12, %v1080_v40 }
 0x150   : > { %4770 = vmatmul.mubr.msk.bf16.vlgmr.msra.gmra.mxu0 %vm488_vm9, %v4768_v39  ;;  %4771 = vmatprep.subr.msk.bf16.mxu1 %vm492_vm8, %v1085_v8 }
 0x151   : > { %1157 = vmatpush1.bf16.msra.mxu1 %v1096_v43  ;;  %v1428_v59 = vpop.permute.xlu0 %1427  ;;  %1238 = vmatpush1.bf16.msra.mxu0 %v1212_v41 }
 0x152   : > { %v1426_v44 = vpop.permute.xlu1 %1425  ;;  %1255 = vmatprep.mubr.bf16.mxu0 %v5147_v6  ;;  %4776 = vmatprep.subr.msk.bf16.mxu1 %vm492_vm8, %v1207_v42 }
 0x153   : > { %v1434_v47 = vsel %vm1037_vm3, %v1426_v44, %v1428_v59  ;;  %v1433_v48 = vsel %vm1037_vm3, %v1424_v38, %v1426_v44 }
 0x154   : > { %4772 = vmatmul.mubr.msk.bf16.vlgmr.msra.gmra.mxu1 %vm488_vm9, %v4768_v39  ;;  %4781 = vmatprep.subr.msk.bf16.mxu0 %vm492_vm8, %v1434_v47  ;;  %v1441_v51 = vsel %vm492_vm8, %v1433_v48, 0 }
 0x155   : > { %v1432_v49 = vpop.permute.xlu0 %1431  ;;  %1279 = vmatpush1.bf16.msra.mxu1 %v1218_v45  ;;  %1296 = vmatprep.mubr.bf16.mxu1 %v5147_v6 }
 0x156   : > { %v1653_v33 = vpop.permute.xlu1 %1652 }
 0x158   : > { %4775 = vmatmul.mubr.msk.bf16.vlgmr.msra.gmra.mxu0 %vm488_vm9, %v4773_v50 }
 0x159   : > { %1467 = vmatpush1.bf16.msra.mxu0 %v1441_v51  ;;  %v1655_v52 = vpop.permute.xlu0 %1654  ;;  %1484 = vmatprep.mubr.bf16.mxu0 %v5147_v6 }
 0x15a   : > { %v1657_v53 = vpop.permute.xlu1 %1656  ;;  %v1662_v54 = vsel %vm806_vm2, %v1653_v33, %v1655_v52 }
 0x15b   : > { %v1663_v10 = vsel %vm806_vm2, %v1655_v52, %v1657_v53  ;;  %v1670_v60 = vsel %vm492_vm8, %v1662_v54, 0 }
 0x15c   : > { %4777 = vmatmul.mubr.msk.bf16.vlgmr.msra.gmra.mxu1 %vm488_vm9, %v4773_v50  ;;  %4788 = vmatprep.subr.msk.bf16.mxu0 %vm492_vm8, %v1663_v10 }
 0x15d   : > { %v1882_v55 = vpop.permute.xlu0 %1881  ;;  %1525 = vmatprep.mubr.bf16.mxu1 %v5147_v6 }
 0x15e   : > { %v1430_v56 = vpop.permute.xlu1 %1429 }
 0x15f   : > { %v1435_v57 = vsel %vm1037_vm3, %v1428_v59, %v1430_v56  ;;  %v1436_v58 = vsel %vm1037_vm3, %v1430_v56, %v1432_v49 }
 0x160   : > { %v1447_v61 = vsel %vm492_vm8, %v1435_v57, 0  ;;  %4782 = vmatmul.mubr.msk.bf16.vlgmr.msra.gmra.mxu0 %vm488_vm9, %v4780_v46  ;;  %4783 = vmatprep.subr.msk.bf16.mxu1 %vm492_vm8, %v1436_v58 }
 0x161   : > { %1696 = vmatpush1.bf16.msra.mxu0 %v1670_v60  ;;  %1508 = vmatpush1.bf16.msra.mxu1 %v1447_v61  ;;  %v1659_v62 = vpop.permute.xlu0 %1658 }
 0x162   : > { %v1664_v63 = vsel %vm806_vm2, %v1657_v53, %v1659_v62  ;;  %v1661_v0 = vpop.permute.xlu1 %1660  ;;  %1713 = vmatprep.mubr.bf16.mxu0 %v5147_v6 }
 0x163   : > { %v1676_v1 = vsel %vm492_vm8, %v1664_v63, 0  ;;  %v1665_v2 = vsel %vm806_vm2, %v1659_v62, %v1661_v0 }
 0x164   : > { %4784 = vmatmul.mubr.msk.bf16.vlgmr.msra.gmra.mxu1 %vm488_vm9, %v4780_v46  ;;  %4790 = vmatprep.subr.msk.bf16.mxu1 %vm492_vm8, %v1665_v2 }
 0x165   : > { %1737 = vmatpush1.bf16.msra.mxu1 %v1676_v1  ;;  %v1886_v3 = vpop.permute.xlu0 %1885  ;;  %1754 = vmatprep.mubr.bf16.mxu1 %v5147_v6 }
 0x166   : > { %v1884_v5 = vpop.permute.xlu1 %1883 }
 0x167   : > { %v1891_v7 = vsel %vm439_vm0, %v1882_v55, %v1884_v5  ;;  %v1892_v9 = vsel %vm439_vm0, %v1884_v5, %v1886_v3 }
 0x168   : > { %v1899_v11 = vsel %vm492_vm8, %v1891_v7, 0  ;;  %4789 = vmatmul.mubr.msk.bf16.vlgmr.msra.gmra.mxu0 %vm488_vm9, %v4787_v4  ;;  %4795 = vmatprep.subr.msk.bf16.mxu0 %vm492_vm8, %v1892_v9 }
 0x169   : > { %1925 = vmatpush1.bf16.msra.mxu0 %v1899_v11  ;;  %v1890_v13 = vpop.permute.xlu0 %1889  ;;  %1942 = vmatprep.mubr.bf16.mxu0 %v5147_v6 }
 0x16a   : > { %v2111_v14 = vpop.permute.xlu1 %2110 }
 0x16c   : > { %4791 = vmatmul.mubr.msk.bf16.vlgmr.msra.gmra.mxu1 %vm488_vm9, %v4787_v4 }
 0x16d   : > { %v2113_v16 = vpop.permute.xlu0 %2112  ;;  %1983 = vmatprep.mubr.bf16.mxu1 %v5147_v6 }
 0x16e   : > { %v1888_v18 = vpop.permute.xlu1 %1887  ;;  %v2120_v22 = vsel %vm353_vm1, %v2111_v14, %v2113_v16 }
 0x16f   : > { %v1893_v19 = vsel %vm439_vm0, %v1886_v3, %v1888_v18  ;;  %v1894_v20 = vsel %vm439_vm0, %v1888_v18, %v1890_v13  ;;  %v2128_v26 = vsel %vm492_vm8, %v2120_v22, 0 }
 0x170   : > { %v1905_v21 = vsel %vm492_vm8, %v1893_v19, 0  ;;  %4796 = vmatmul.mubr.msk.bf16.vlgmr.msra.gmra.mxu0 %vm488_vm9, %v4794_v17  ;;  %4797 = vmatprep.subr.msk.bf16.mxu1 %vm492_vm8, %v1894_v20 }
 0x171   : > { %1966 = vmatpush1.bf16.msra.mxu1 %v1905_v21  ;;  %2171 = vmatprep.mubr.bf16.mxu0 %v5147_v6  ;;  %v2117_v23 = vpop.permute.xlu0 %2116 }
 0x172   : > { %v2115_v24 = vpop.permute.xlu1 %2114 }
 0x173   : > { %v2121_v25 = vsel %vm353_vm1, %v2113_v16, %v2115_v24  ;;  %v2122_v27 = vsel %vm353_vm1, %v2115_v24, %v2117_v23 }
 0x174   : > { %4798 = vmatmul.mubr.msk.bf16.vlgmr.msra.gmra.mxu1 %vm488_vm9, %v4794_v17  ;;  %4802 = vmatprep.subr.msk.bf16.mxu0 %vm492_vm8, %v2121_v25  ;;  %v2134_v12 = vsel %vm492_vm8, %v2122_v27, 0 }
 0x175   : > { %2154 = vmatpush1.bf16.msra.mxu0 %v2128_v26  ;;  %2212 = vmatprep.mubr.bf16.mxu1 %v5147_v6 }
 0x176   : > { %v2119_v30 = vpop.permute.xlu1 %2118 }
 0x177   : > { %v2123_v31 = vsel %vm353_vm1, %v2117_v23, %v2119_v30 }
 0x178   : > { %4803 = vmatmul.mubr.msk.bf16.vlgmr.msra.gmra.mxu0 %vm488_vm9, %v4801_v29  ;;  %4804 = vmatprep.subr.msk.bf16.mxu1 %vm492_vm8, %v2123_v31 }
 0x179   : > { %2195 = vmatpush1.bf16.msra.mxu1 %v2134_v12  ;;  %2514 = vmatprep.mubr.bf16.mxu0 %v5147_v6 }
 0x17c   : > { %4805 = vmatmul.mubr.msk.bf16.vlgmr.msra.gmra.mxu1 %vm488_vm9, %v4801_v29 }
 0x17d   : > { %2555 = vmatprep.mubr.bf16.mxu1 %v5147_v6 }
 0x1f4   : > { %v539_v32 = vpop.f32.mrf.mxu0 }
 0x1f6   : > { %v541_v34 = vpop.f32.mrf.mxu0 }
 0x1f8   : > { %v543_v35 = vpop.f32.mrf.mxu0 }
 0x1fa   : > { %v544_v36 = vpop.f32.mrf.mxu0 }
 0x1fc   : > { %v580_v28 = vpop.f32.mrf.mxu1  ;;  %v677_v37 = vpop.f32.mrf.mxu0 }
 0x1fd   : > { %v678_v22 = vadd.f32 %v677_v37, %v539_v32 }
 0x1fe   : > { %v582_v38 = vpop.f32.mrf.mxu1  ;;  %v679_v39 = vpop.f32.mrf.mxu0 }
 0x1ff   : > { %v680_v23 = vadd.f32 %v679_v39, %v541_v34 }
 0x200   : > { %v584_v40 = vpop.f32.mrf.mxu1  ;;  %v681_v41 = vpop.f32.mrf.mxu0 }
 0x202   : > { %v585_v42 = vpop.f32.mrf.mxu1  ;;  %v682_v8 = vpop.f32.mrf.mxu0 }
 0x204   : > { %v718_v43 = vpop.f32.mrf.mxu1  ;;  %v904_v59 = vpop.f32.mrf.mxu0 }
 0x205   : > { %v719_v26 = vadd.f32 %v718_v43, %v580_v28  ;;  %v952_v27 = vadd.f32 %v904_v59, %v678_v22  ;;  %v2418_v22 = vpop.permute.xlu0 %2417 }
 0x206   : > { %v720_v44 = vpop.f32.mrf.mxu1  ;;  %v906_v45 = vpop.f32.mrf.mxu0 }
 0x207   : > { %v953_v29 = vadd.f32 %v906_v45, %v680_v23  ;;  %v721_v12 = vadd.f32 %v720_v44, %v582_v38 }
 0x208   : > { %v722_v47 = vpop.f32.mrf.mxu1  ;;  %v908_v48 = vpop.f32.mrf.mxu0 }
 0x20a   : > { %v723_v49 = vpop.f32.mrf.mxu1  ;;  %v909_v50 = vpop.f32.mrf.mxu0 }
 0x20c   : > { %v945_v33 = vpop.f32.mrf.mxu1 }
 0x20d   : > { %v954_v35 = vadd.f32 %v945_v33, %v719_v26 }
 0x20e   : > { %v947_v51 = vpop.f32.mrf.mxu1 }
 0x20f   : > { %v955_v8 = vadd.f32 %v947_v51, %v721_v12 }
 0x210   : > { %v949_v52 = vpop.f32.mrf.mxu1  ;;  %v1135_v53 = vpop.f32.mrf.mxu0 }
 0x211   : > { %v1183_v36 = vadd.f32 %v1135_v53, %v952_v27 }
 0x212   : > { %v950_v10 = vpop.f32.mrf.mxu1  ;;  %v1137_v54 = vpop.f32.mrf.mxu0 }
 0x213   : > { %v1184_v40 = vadd.f32 %v1137_v54, %v953_v29 }
 0x214   : > { %v1139_v55 = vpop.f32.mrf.mxu0  ;;  %v1176_v46 = vpop.f32.mrf.mxu1 }
 0x215   : > { %v1185_v47 = vadd.f32 %v1176_v46, %v954_v35 }
 0x216   : > { %v1140_v56 = vpop.f32.mrf.mxu0  ;;  %v1178_v57 = vpop.f32.mrf.mxu1 }
 0x217   : > { %v1186_v34 = vadd.f32 %v1178_v57, %v955_v8 }
 0x218   : > { %v1180_v58 = vpop.f32.mrf.mxu1  ;;  %v1257_v60 = vpop.f32.mrf.mxu0 }
 0x219   : > { %v1305_v48 = vadd.f32 %v1257_v60, %v1183_v36 }
 0x21a   : > { %v1181_v61 = vpop.f32.mrf.mxu1  ;;  %v1259_v62 = vpop.f32.mrf.mxu0 }
 0x21b   : > { %v1306_v49 = vadd.f32 %v1259_v62, %v1184_v40 }
 0x21c   : > { %v1261_v63 = vpop.f32.mrf.mxu0  ;;  %v1298_v0 = vpop.f32.mrf.mxu1 }
 0x21d   : > { %v1307_v37 = vadd.f32 %v1298_v0, %v1185_v47 }
 0x21e   : > { %v1262_v1 = vpop.f32.mrf.mxu0  ;;  %v1300_v2 = vpop.f32.mrf.mxu1 }
 0x21f   : > { %v1308_v45 = vadd.f32 %v1300_v2, %v1186_v34 }
 0x220   : > { %v1302_v3 = vpop.f32.mrf.mxu1  ;;  %v1486_v4 = vpop.f32.mrf.mxu0 }
 0x221   : > { %v1534_v39 = vadd.f32 %v1486_v4, %v1305_v48 }
 0x222   : > { %v1303_v5 = vpop.f32.mrf.mxu1  ;;  %v1488_v7 = vpop.f32.mrf.mxu0 }
 0x223   : > { %v1535_v28 = vadd.f32 %v1488_v7, %v1306_v49 }
 0x224   : > { %v1490_v9 = vpop.f32.mrf.mxu0  ;;  %v1527_v11 = vpop.f32.mrf.mxu1 }
 0x225   : > { %v1536_v52 = vadd.f32 %v1527_v11, %v1307_v37 }
 0x226   : > { %v1491_v13 = vpop.f32.mrf.mxu0  ;;  %v1529_v14 = vpop.f32.mrf.mxu1 }
 0x227   : > { %v1537_v10 = vadd.f32 %v1529_v14, %v1308_v45 }
 0x228   : > { %v1531_v16 = vpop.f32.mrf.mxu1  ;;  %v1715_v17 = vpop.f32.mrf.mxu0 }
 0x229   : > { %v1763_v38 = vadd.f32 %v1715_v17, %v1534_v39 }
 0x22a   : > { %v1532_v18 = vpop.f32.mrf.mxu1  ;;  %v1717_v19 = vpop.f32.mrf.mxu0 }
 0x22b   : > { %v1764_v44 = vadd.f32 %v1717_v19, %v1535_v28 }
 0x22c   : > { %v1719_v20 = vpop.f32.mrf.mxu0  ;;  %v1756_v21 = vpop.f32.mrf.mxu1 }
 0x22d   : > { %v1765_v54 = vadd.f32 %v1756_v21, %v1536_v52  ;;  %v2334_v21 = vpop.permute.xlu1 %2333 }
 0x22e   : > { %v1720_v24 = vpop.f32.mrf.mxu0  ;;  %v1758_v25 = vpop.f32.mrf.mxu1  ;;  %v2335_v23 = vrot.slane %v2334_v21, 6 }
 0x22f   : > { %v1766_v58 = vadd.f32 %v1758_v25, %v1537_v10  ;;  %v2419_v24 = vrot.slane %v2418_v22, 6 }
 0x230   : > { %v1760_v30 = vpop.f32.mrf.mxu1  ;;  %v1944_v31 = vpop.f32.mrf.mxu0  ;;  %v2336_v27 = vsel %vm353_vm1, %v2335_v23, %v2334_v21 }
 0x231   : > { %v1992_v51 = vadd.f32 %v1944_v31, %v1763_v38  ;;  %v2420_v29 = vsel %vm439_vm0, %v2419_v24, %v2418_v22  ;;  %v3007_v37 = vpop.permute.xlu1 %3006 }
 0x232   : > { %v1761_v41 = vpop.f32.mrf.mxu1  ;;  %v1946_v42 = vpop.f32.mrf.mxu0 }
 0x233   : > { %v1993_v55 = vadd.f32 %v1946_v42, %v1764_v44  ;;  %v2779_v42 = vpop.permute.xlu0 %2778 }
 0x234   : > { %v1948_v50 = vpop.f32.mrf.mxu0  ;;  %v1985_v32 = vpop.f32.mrf.mxu1  ;;  %v2780_v48 = vrot.slane %v2779_v42, 6 }
 0x235   : > { %v1994_v60 = vadd.f32 %v1985_v32, %v1765_v54 }
 0x236   : > { %v1949_v43 = vpop.f32.mrf.mxu0  ;;  %v1987_v59 = vpop.f32.mrf.mxu1  ;;  %v2781_v32 = vsel %vm806_vm2, %v2780_v48, %v2779_v42 }
 0x237   : > { %v1995_v0 = vadd.f32 %v1987_v59, %v1766_v58  ;;  %v3008_v59 = vrot.slane %v3007_v37, 6 }
 0x238   : > { %v1989_v33 = vpop.f32.mrf.mxu1  ;;  %v2173_v53 = vpop.f32.mrf.mxu0 }
 0x239   : > { %v2221_v57 = vadd.f32 %v2173_v53, %v1992_v51  ;;  %v3009_v38 = vsel %vm1037_vm3, %v3008_v59, %v3007_v37  ;;  %v3736_v37 = vld [vmem:[#allocation3 + $0xa] sm:$0x3] }
 0x23a   : > { %v1990_v46 = vpop.f32.mrf.mxu1  ;;  %v2175_v56 = vpop.f32.mrf.mxu0 }
 0x23b   : > { %v2222_v61 = vadd.f32 %v2175_v56, %v1993_v55  ;;  %v2225_v5 = vmax.f32 %v2221_v57, 0.0  ;;  %v3357_v55 = vpop.permute.xlu0 %3356 }
 0x23c   : > { %v2177_v62 = vpop.f32.mrf.mxu0  ;;  %v2214_v63 = vpop.f32.mrf.mxu1  ;;  %v3358_v58 = vrot.slane %v3357_v55, 6 }
 0x23d   : > { %v2226_v1 = vmax.f32 %v2222_v61, 0.0  ;;  %v2223_v2 = vadd.f32 %v2214_v63, %v1994_v60 }
 0x23e   : > { %v2178_v3 = vpop.f32.mrf.mxu0  ;;  %v2216_v4 = vpop.f32.mrf.mxu1  ;;  %v3359_v63 = vsel %vm1081_vm4, %v3358_v58, %v3357_v55 }
 0x23f   : > { %v2224_v7 = vadd.f32 %v2216_v4, %v1995_v0  ;;  %v4806_v11 = vpack.c.bf16 %v2226_v1, %v2225_v5  ;;  %v2227_v13 = vmax.f32 %v2223_v2, 0.0  ;;  %v3585_v1 = vpop.permute.xlu1 %3584  ;;  %v3813_v21 = vpop.permute.xlu0 %3812 }
 0x240   : > { %v2218_v9 = vpop.f32.mrf.mxu1  ;;  %v3586_v5 = vrot.slane %v3585_v1, 6 }
 0x241   : > { %v2228_v14 = vmax.f32 %v2224_v7, 0.0  ;;  %v2245_v18 = vrot.slane %v4806_v11, %v5275_v15 }
 0x242   : > { %v2219_v16 = vpop.f32.mrf.mxu1 }
 0x243   : > { %v4807_v17 = vpack.c.bf16 %v2228_v14, %v2227_v13  ;;  %v3587_v13 = vsel %vm850_vm5, %v3586_v5, %v3585_v1 }
 0x245   : > { %v5665_v19 = vrot.slane %v4807_v17, %v5275_v15 }
 0x247   : > { %v5668_v20 = vcombine.low %v2245_v18, %v5665_v19  ;;  %v3280_v18 = vld [vmem:[#allocation3 + $0xa] sm:$0x3] }
 0x249   : > { %2255 = vst [vmem:[#allocation3 + $0x2] sm:$0xff] %v5668_v20  ;;  %v3362_v2 = vmul.bf16 %v3359_v63, %v5668_v20  ;;  %v3590_v14 = vmul.bf16 %v3587_v13, %v5668_v20  ;;  %v4811_v63 = vld [vmem:[%s5934_s2 + $0x4] sm:$0xf] }
 0x24b   : > { %v3375_v11 = vrot.slane %v3362_v2, %v5275_v15  ;;  %v3368_v16 = vcombine.high %v3362_v2, %v3362_v2  ;;  %v3596_v22 = vcombine.high %v3590_v14, %v3590_v14 }
 0x24d   : > { %v3383_v17 = vcombine.high %v3375_v11, %v3375_v11 }
 0x250   : > { %v2256_v25 = vld [vmem:[#allocation3] sm:$0xff]  ;;  %v2257_v26 = vld [vmem:[#allocation3 + $0x8] sm:$0x3] }
 0x251   : > { %v2339_v30 = vmul.bf16 %v2336_v27, %v2256_v25  ;;  %v2423_v31 = vmul.bf16 %v2420_v29, %v2256_v25  ;;  %v2424_v12 = vmul.bf16 %v2419_v24, %v2257_v26  ;;  %v2340_v34 = vmul.bf16 %v2335_v23, %v2257_v26  ;;  %v2702_v54 = vld [vmem:[#allocation3 + $0x8] sm:$0x3] }
 0x252   : > { %v2784_v39 = vmul.bf16 %v2781_v32, %v2256_v25  ;;  %v3012_v44 = vmul.bf16 %v3009_v38, %v2256_v25  ;;  %v2785_v51 = vmul.bf16 %v2780_v48, %v2702_v54  ;;  %v2930_v62 = vld [vmem:[#allocation3 + $0x8] sm:$0x3]  ;;  %v3363_v23 = vmul.bf16 %v3358_v58, %v3280_v18  ;;  %v3964_v38 = vld [vmem:[#allocation3 + $0xa] sm:$0x3] }
 0x253   : > { %v2573_v35 = vrot.slane %v2339_v30, %v5275_v15  ;;  %v2436_v36 = vrot.slane %v2423_v31, %v5275_v15  ;;  %v2566_v40 = vcombine.high %v2339_v30, %v2339_v30  ;;  %v2429_v41 = vcombine.high %v2423_v31, %v2423_v31  ;;  %v3508_v30 = vld [vmem:[#allocation3 + $0xa] sm:$0x3] }
 0x254   : > { %v2452_v8 = vrot.slane %v2424_v12, %v5275_v15  ;;  %v2589_v45 = vrot.slane %v2340_v34, %v5275_v15  ;;  %v2797_v52 = vrot.slane %v2784_v39, %v5275_v15  ;;  %v2790_v33 = vcombine.high %v2784_v39, %v2784_v39  ;;  %v4041_v12 = vpop.permute.xlu1 %4040 }
 0x255   : > { %2590 = vrot.lane.b32.xlu1 %v2573_v35, %s5155_s16  ;;  %2453 = vrot.lane.b32.xlu0 %v2436_v36, %s5154_s14  ;;  %v2444_v47 = vcombine.high %v2436_v36, %v2436_v36  ;;  %v2580_v49 = vrot.slane %v2566_v40, %v5275_v15  ;;  %v2443_v50 = vrot.slane %v2429_v41, %v5275_v15  ;;  %v3814_v26 = vrot.slane %v3813_v21, 6 }
 0x256   : > { %v2581_v28 = vcombine.high %v2573_v35, %v2573_v35  ;;  %v2805_v10 = vcombine.high %v2797_v52, %v2797_v52  ;;  %v3025_v46 = vrot.slane %v3012_v44, %v5275_v15  ;;  %v2804_v56 = vrot.slane %v2790_v33, %v5275_v15 }
 0x257   : > { %v2445_v43 = vcombine.high %v2443_v50, %v2443_v50  ;;  %v2582_v53 = vcombine.high %v2580_v49, %v2580_v49  ;;  %v3018_v60 = vcombine.high %v3012_v44, %v3012_v44  ;;  %v2813_v57 = vrot.slane %v2785_v51, %v5275_v15 }
 0x258   : > { %v2806_v61 = vcombine.high %v2804_v56, %v2804_v56  ;;  %v3013_v0 = vmul.bf16 %v3008_v59, %v2930_v62  ;;  %v3033_v3 = vcombine.high %v3025_v46, %v3025_v46  ;;  %v3603_v24 = vrot.slane %v3590_v14, %v5275_v15  ;;  %v2341_v14 = vld [vmem:[%s5934_s2] sm:$0xf] }
 0x259   : > { %2461 = vrot.lane.b32.xlu0 %v2452_v8, %s5154_s14  ;;  %2455 = vrot.lane.b32.xlu1 %v2444_v47, %s5154_s14  ;;  %v3032_v4 = vrot.slane %v3018_v60, %v5275_v15  ;;  %v3382_v25 = vrot.slane %v3368_v16, %v5275_v15  ;;  %v3610_v27 = vrot.slane %v3596_v22, %v5275_v15  ;;  %v4042_v42 = vrot.slane %v4041_v12, 6 }
 0x25a   : > { %v3041_v9 = vrot.slane %v3013_v0, %v5275_v15  ;;  %v3391_v29 = vrot.slane %v3363_v23, %v5275_v15  ;;  %v3815_v31 = vsel %vm483_vm6, %v3814_v26, %v3813_v21  ;;  %v3591_v35 = vmul.bf16 %v3586_v5, %v3508_v30 }
 0x25b   : > { %v3034_v7 = vcombine.high %v3032_v4, %v3032_v4  ;;  %v3818_v36 = vmul.bf16 %v3815_v31, %v5668_v20  ;;  %v3611_v40 = vcombine.high %v3603_v24, %v3603_v24  ;;  %v3384_v41 = vcombine.high %v3382_v25, %v3382_v25 }
 0x25c   : > { %v3619_v8 = vrot.slane %v3591_v35, %v5275_v15  ;;  %v4043_v48 = vsel %vm623_vm7, %v4042_v42, %v4041_v12  ;;  %v3612_v32 = vcombine.high %v3610_v27, %v3610_v27  ;;  %v3819_v39 = vmul.bf16 %v3814_v26, %v3736_v37 }
 0x25d   : > { %2594 = vrot.lane.b32.xlu1 %v2580_v49, %s5155_s16  ;;  %2457 = vrot.lane.b32.xlu0 %v2443_v50, %s5154_s14  ;;  %v3831_v47 = vrot.slane %v3818_v36, %v5275_v15  ;;  %v4046_v49 = vmul.bf16 %v4043_v48, %v5668_v20  ;;  %v3824_v50 = vcombine.high %v3818_v36, %v3818_v36 }
 0x25e   : > { %v4047_v44 = vmul.bf16 %v4042_v42, %v3964_v38 }
 0x25f   : > { %v3839_v34 = vcombine.high %v3831_v47, %v3831_v47  ;;  %v4052_v59 = vcombine.high %v4046_v49, %v4046_v49 }
 0x260   : > { %v4075_v54 = vrot.slane %v4047_v44, %v5275_v15 }
 0x261   : > { %2592 = vrot.lane.b32.xlu0 %v2581_v28, %s5155_s16  ;;  %2459 = vrot.lane.b32.xlu1 %v2445_v43, %s5154_s14  ;;  %v4059_v28 = vrot.slane %v4046_v49, %v5275_v15  ;;  %v3838_v43 = vrot.slane %v3824_v50, %v5275_v15 }
 0x263   : > { %v4067_v33 = vcombine.high %v4059_v28, %v4059_v28 }
 0x265   : > { %2598 = vrot.lane.b32.xlu1 %v2589_v45, %s5155_s16  ;;  %2814 = vrot.lane.b32.xlu0 %v2797_v52, %s5153_s13  ;;  %v3847_v45 = vrot.slane %v3819_v39, %v5275_v15  ;;  %v3840_v52 = vcombine.high %v3838_v43, %v3838_v43 }
 0x269   : > { %2596 = vrot.lane.b32.xlu0 %v2582_v53, %s5155_s16  ;;  %2816 = vrot.lane.b32.xlu1 %v2805_v10, %s5153_s13  ;;  %v4066_v53 = vrot.slane %v4052_v59, %v5275_v15  ;;  %s4904_s16 = sshll.u32 %s5213_s25, 6 }
 0x26a   : > { %s4665_s17 = scalar_lea.hbm %s5938_s6, %s4904_s16 }
 0x26b   : > { %v4068_v10 = vcombine.high %v4066_v53, %v4066_v53 }
 0x26d   : > { %3042 = vrot.lane.b32.xlu1 %v3025_v46, %s5152_s12  ;;  %2818 = vrot.lane.b32.xlu0 %v2804_v56, %s5153_s13 }
 0x271   : > { %2822 = vrot.lane.b32.xlu0 %v2813_v57, %s5153_s13  ;;  %2820 = vrot.lane.b32.xlu1 %v2806_v61, %s5153_s13  ;;  %s257_s13 = sand.u32 1, %s5132_s22  }
 0x272   : > { %s4744_s14 = sshll.u32 %s257_s13, 2  ;;  %s4654_s20 = scalar_lea.sflag [#allocation6], %s257_s13 }
 0x273   : > { %s259_s26 = scalar_lea.vmem [#allocation7], %s4744_s14 }
 0x274   : > { %s4667_s28 = sshll.u32 %s259_s26, 4  ;;  %s4668_s28 = int_to_ptr.vmem [resolvable:$true] %s4667_s28 }
 0x275   : > { %3044 = vrot.lane.b32.xlu0 %v3033_v3, %s5152_s12  ;;  %3046 = vrot.lane.b32.xlu1 %v3032_v4, %s5152_s12 }
 0x279   : > { %3048 = vrot.lane.b32.xlu0 %v3034_v7, %s5152_s12  ;;  %3050 = vrot.lane.b32.xlu1 %v3041_v9, %s5152_s12 }
 0x27d   : > { %3392 = vrot.lane.b32.xlu0 %v3375_v11, %s5151_s11  ;;  %3394 = vrot.lane.b32.xlu1 %v3383_v17, %s5151_s11 }
 0x281   : > { %3620 = vrot.lane.b32.xlu1 %v3603_v24, %s5150_s19  ;;  %3396 = vrot.lane.b32.xlu0 %v3382_v25, %s5151_s11 }
 0x285   : > { %3624 = vrot.lane.b32.xlu1 %v3610_v27, %s5150_s19  ;;  %3400 = vrot.lane.b32.xlu0 %v3391_v29, %s5151_s11  ;;  %v4822_v29 = vld [vmem:[%s5934_s2 + $0x8] sm:$0xf] }
 0x289   : > { %3622 = vrot.lane.b32.xlu0 %v3611_v40, %s5150_s19  ;;  %3398 = vrot.lane.b32.xlu1 %v3384_v41, %s5151_s11  ;;  %v3168_v40 = vrot.slane %v5668_v20, %v5275_v15  ;;  %v5049_v41 = vcombine.low %v5665_v19, %v5665_v19  ;;  %v4829_v19 = vld [vmem:[%s5934_s2 + $0xc] sm:$0xf] }
 0x28b   : > { %v3176_v50 = vcombine.high %v3168_v40, %v3168_v40  ;;  %v3175_v20 = vrot.slane %v5049_v41, %v5275_v15 }
 0x28d   : > { %3628 = vrot.lane.b32.xlu1 %v3619_v8, %s5150_s19  ;;  %3848 = vrot.lane.b32.xlu0 %v3831_v47, %s5148_s15  ;;  %v3177_v59 = vcombine.high %v3175_v20, %v3175_v20  ;;  %v3188_v38 = vsel %vm492_vm8, %v3175_v20, 0 }
 0x291   : > { %3626 = vrot.lane.b32.xlu0 %v3612_v32, %s5150_s19  ;;  %3850 = vrot.lane.b32.xlu1 %v3839_v34, %s5148_s15  ;;  %s5156_s19 = smov [#allocation7]  }
 0x295   : > { %4076 = vrot.lane.b32.xlu1 %v4059_v28, %s5149_s18  ;;  %3852 = vrot.lane.b32.xlu0 %v3838_v43, %s5148_s15  ;;  %v3182_v43 = vsel %vm492_vm8, %v3168_v40, 0 }
 0x299   : > { %3856 = vrot.lane.b32.xlu0 %v3847_v45, %s5148_s15  ;;  %3854 = vrot.lane.b32.xlu1 %v3840_v52, %s5148_s15  ;;  %s5076_s15 = scalar_lea.vmem %s4668_s28, 64 }
 0x29a   : > { %p5077_p8 = scmp.ne.s32.totalorder %s4668_s28, %s5076_s15 }
 0x29c   : > { %p5078_p9 = pnand %p5077_p8, %p5230_p5 }
 0x29d   : > { %4078 = vrot.lane.b32.xlu0 %v4067_v33, %s5149_s18  ;;  %4080 = vrot.lane.b32.xlu1 %v4066_v53, %s5149_s18  ;;  %v4834_v33 = vld [vmem:[%s5934_s2 + $0x10] sm:$0xf] }
 0x29e   : > { %p5079_p10 = pneg %p5078_p9 }
 0x2a1   : > { %4082 = vrot.lane.b32.xlu0 %v4068_v10, %s5149_s18  ;;  %4084 = vrot.lane.b32.xlu1 %v4075_v54, %s5149_s18 }
 0x2c7   : > { %v2591_v51 = vpop.permute.xlu1 %2590  ;;  %v2454_v55 = vpop.permute.xlu0 %2453 }
 0x2cb   : > { %v2456_v46 = vpop.permute.xlu1 %2455  ;;  %v2462_v56 = vpop.permute.xlu0 %2461 }
 0x2cc   : > { %v2463_v58 = vsel %vm483_vm6, %v2454_v55, %v2456_v46 }
 0x2cd   : > { %v2471_v62 = vsel %vm492_vm8, %v2463_v58, 0 }
 0x2cf   : > { %v2595_v60 = vpop.permute.xlu1 %2594  ;;  %v2458_v57 = vpop.permute.xlu0 %2457 }
 0x2d0   : > { %v2464_v61 = vsel %vm483_vm6, %v2456_v46, %v2458_v57 }
 0x2d1   : > { %4812 = vmatprep.subr.msk.bf16.mxu0 %vm492_vm8, %v2464_v61 }
 0x2d2   : > { %2497 = vmatpush1.bf16.msra.mxu0 %v2471_v62 }
 0x2d3   : > { %v2460_v0 = vpop.permute.xlu1 %2459  ;;  %v2593_v1 = vpop.permute.xlu0 %2592 }
 0x2d4   : > { %v2465_v2 = vsel %vm483_vm6, %v2458_v57, %v2460_v0  ;;  %v2466_v3 = vsel %vm483_vm6, %v2460_v0, %v2462_v56  ;;  %v2600_v4 = vsel %vm623_vm7, %v2591_v51, %v2593_v1  ;;  %v2601_v5 = vsel %vm623_vm7, %v2593_v1, %v2595_v60  ;;  %v4841_v56 = vld [vmem:[%s5934_s2 + $0x14] sm:$0xf] }
 0x2d5   : > { %v2477_v7 = vsel %vm492_vm8, %v2465_v2, 0  ;;  %v2608_v9 = vsel %vm492_vm8, %v2600_v4, 0  ;;  %4813 = vmatmul.mubr.msk.bf16.vlgmr.msra.gmra.mxu0 %vm488_vm9, %v4811_v63  ;;  %4814 = vmatprep.subr.msk.bf16.mxu1 %vm492_vm8, %v2466_v3  ;;  %v4848_v4 = vld [vmem:[%s5934_s2 + $0x18] sm:$0xf] }
 0x2d6   : > { %4816 = vmatprep.subr.msk.bf16.mxu0 %vm492_vm8, %v2601_v5  ;;  %2538 = vmatpush1.bf16.msra.mxu1 %v2477_v7 }
 0x2d7   : > { %2634 = vmatpush1.bf16.msra.mxu0 %v2608_v9  ;;  %v2599_v11 = vpop.permute.xlu1 %2598  ;;  %v2815_v13 = vpop.permute.xlu0 %2814  ;;  %2651 = vmatprep.mubr.bf16.mxu0 %v5147_v6 }
 0x2d9   : > { %4815 = vmatmul.mubr.msk.bf16.vlgmr.msra.gmra.mxu1 %vm488_vm9, %v4811_v63 }
 0x2da   : > { %2692 = vmatprep.mubr.bf16.mxu1 %v5147_v6 }
 0x2db   : > { %v2817_v16 = vpop.permute.xlu1 %2816  ;;  %v2597_v17 = vpop.permute.xlu0 %2596 }
 0x2dc   : > { %v2602_v18 = vsel %vm623_vm7, %v2595_v60, %v2597_v17  ;;  %v2603_v21 = vsel %vm623_vm7, %v2597_v17, %v2599_v11  ;;  %v2824_v23 = vsel %vm850_vm5, %v2815_v13, %v2817_v16 }
 0x2dd   : > { %v2614_v22 = vsel %vm492_vm8, %v2602_v18, 0  ;;  %4817 = vmatmul.mubr.msk.bf16.vlgmr.msra.gmra.mxu0 %vm488_vm9, %v2341_v14  ;;  %4818 = vmatprep.subr.msk.bf16.mxu1 %vm492_vm8, %v2603_v21  ;;  %v2832_v27 = vsel %vm492_vm8, %v2824_v23, 0 }
 0x2de   : > { %2675 = vmatpush1.bf16.msra.mxu1 %v2614_v22  ;;  %2875 = vmatprep.mubr.bf16.mxu0 %v5147_v6  ;;  %v4855_v22 = vld [vmem:[%s5934_s2 + $0x1c] sm:$0xf] }
 0x2df   : > { %v3043_v24 = vpop.permute.xlu1 %3042  ;;  %v2819_v25 = vpop.permute.xlu0 %2818 }
 0x2e0   : > { %v2825_v26 = vsel %vm850_vm5, %v2817_v16, %v2819_v25 }
 0x2e1   : > { %4819 = vmatmul.mubr.msk.bf16.vlgmr.msra.gmra.mxu1 %vm488_vm9, %v2341_v14  ;;  %4823 = vmatprep.subr.msk.bf16.mxu0 %vm492_vm8, %v2825_v26 }
 0x2e2   : > { %2858 = vmatpush1.bf16.msra.mxu0 %v2832_v27  ;;  %2916 = vmatprep.mubr.bf16.mxu1 %v5147_v6 }
 0x2e3   : > { %v2821_v30 = vpop.permute.xlu1 %2820  ;;  %v2823_v31 = vpop.permute.xlu0 %2822 }
 0x2e4   : > { %v2826_v12 = vsel %vm850_vm5, %v2819_v25, %v2821_v30  ;;  %v2827_v35 = vsel %vm850_vm5, %v2821_v30, %v2823_v31  ;;  %v5048_v25 = vld [vmem:[%s5358_s10] sm:$0xff]  ;;  %s5080_s10 = sshll.u32 %s5156_s19, 4  ;;  %s5081_s10 = int_to_ptr.vmem [resolvable:$false] %s5080_s10 }
 0x2e5   : > { %v2838_v36 = vsel %vm492_vm8, %v2826_v12, 0  ;;  %4824 = vmatmul.mubr.msk.bf16.vlgmr.msra.gmra.mxu0 %vm488_vm9, %v4822_v29  ;;  %4825 = vmatprep.subr.msk.bf16.mxu1 %vm492_vm8, %v2827_v35  ;;  %v4200_v26 = vrot.slane %v5048_v25, %v5275_v15  ;;  %v4193_v27 = vcombine.high %v5048_v25, %v5048_v25  ;;  %s5082_s25 = scalar_lea.vmem %s5081_s10, 128  ;;  %p5083_p11 = scmp.lt.s32.totalorder %s4668_s28, %s5081_s10 }
 0x2e6   : > { %2899 = vmatpush1.bf16.msra.mxu1 %v2838_v36  ;;  %3103 = vmatprep.mubr.bf16.mxu0 %v5147_v6  ;;  %p5084_p12 = scmp.lt.s32.totalorder %s5082_s25, %s5076_s15 }
 0x2e7   : > { %v3047_v42 = vpop.permute.xlu1 %3046  ;;  %v3045_v8 = vpop.permute.xlu0 %3044  ;;  %v4208_v36 = vcombine.high %v4200_v26, %v4200_v26  ;;  %v4207_v40 = vrot.slane %v4193_v27, %v5275_v15  ;;  %v4214_v15 = vsel %vm492_vm8, %v4200_v26, 0 }
 0x2e8   : > { %v3052_v47 = vsel %vm1081_vm4, %v3043_v24, %v3045_v8  ;;  %v3053_v48 = vsel %vm1081_vm4, %v3045_v8, %v3047_v42  ;;  %p5085_p13 = por %p5084_p12, %p5083_p11 }
 0x2e9   : > { %v3060_v49 = vsel %vm492_vm8, %v3052_v47, 0  ;;  %4826 = vmatmul.mubr.msk.bf16.vlgmr.msra.gmra.mxu1 %vm488_vm9, %v4822_v29  ;;  %4830 = vmatprep.subr.msk.bf16.mxu0 %vm492_vm8, %v3053_v48  ;;  %v4862_v47 = vld [vmem:[%s5934_s2 + $0x20] sm:$0xf] }
 0x2ea   : > { %3086 = vmatpush1.bf16.msra.mxu0 %v3060_v49  ;;  %3144 = vmatprep.mubr.bf16.mxu1 %v5147_v6  ;;  %p5086_p0 = pnand %p5085_p13, %p5079_p10 }
 0x2eb   : > { %v3051_v32 = vpop.permute.xlu1 %3050  ;;  %4835 = vmatprep.subr.msk.bf16.mxu0 %vm492_vm8, %v3176_v50  ;;  %v3049_v34 = vpop.permute.xlu0 %3048  ;;  %v4209_v50 = vcombine.high %v4207_v40, %v4207_v40 }
 0x2ec   : > { %v3054_v37 = vsel %vm1081_vm4, %v3047_v42, %v3049_v34  ;;  %v3055_v39 = vsel %vm1081_vm4, %v3049_v34, %v3051_v32  ;;  %v4220_v34 = vsel %vm492_vm8, %v4207_v40, 0 }
 0x2ed   : > { %v3066_v28 = vsel %vm492_vm8, %v3054_v37, 0  ;;  %4831 = vmatmul.mubr.msk.bf16.vlgmr.msra.gmra.mxu0 %vm488_vm9, %v4829_v19  ;;  %4832 = vmatprep.subr.msk.bf16.mxu1 %vm492_vm8, %v3055_v39  ;;  %v4191_v37 = vld [vmem:[%s5936_s4] sm:$0xf]  ;;  %v5016_v39 = vld [vmem:[#allocation4 + $0x78] sm:$0xff]  }
 0x2ee   : > { %3127 = vmatpush1.bf16.msra.mxu1 %v3066_v28  ;;  %3208 = vmatpush1.bf16.msra.mxu0 %v3182_v43  ;;  %v5017_v28 = vld [vmem:[#allocation4 + $0x38] sm:$0xff]   ;;  %v5018_v43 = vld [vmem:[#allocation4 + $0x70] sm:$0xff]  }
 0x2ef   : > { %v3395_v45 = vpop.permute.xlu1 %3394  ;;  %4837 = vmatprep.subr.msk.bf16.mxu1 %vm492_vm8, %v3177_v59  ;;  %v3393_v52 = vpop.permute.xlu0 %3392  ;;  %3225 = vmatprep.mubr.bf16.mxu0 %v5147_v6  ;;  %v5019_v59 = vld [vmem:[#allocation4 + $0xf8] sm:$0xff]  }
 0x2f0   : > { %v3402_v44 = vsel %vm1037_vm3, %v3393_v52, %v3395_v45  ;;  %v5021_v52 = vld [vmem:[#allocation4 + $0xb8] sm:$0xff]  }
 0x2f1   : > { %4833 = vmatmul.mubr.msk.bf16.vlgmr.msra.gmra.mxu1 %vm488_vm9, %v4829_v19  ;;  %v3410_v51 = vsel %vm492_vm8, %v3402_v44, 0  ;;  %v5023_v44 = vld [vmem:[#allocation4 + $0xf0] sm:$0xff]  }
 0x2f2   : > { %3249 = vmatpush1.bf16.msra.mxu1 %v3188_v38  ;;  %3266 = vmatprep.mubr.bf16.mxu1 %v5147_v6  ;;  %v5022_v38 = vld [vmem:[#allocation4 + $0x68] sm:$0xff]  }
 0x2f3   : > { %v3621_v53 = vpop.permute.xlu1 %3620  ;;  %v3397_v10 = vpop.permute.xlu0 %3396 }
 0x2f4   : > { %v3403_v54 = vsel %vm1037_vm3, %v3395_v45, %v3397_v10  ;;  %v5020_v45 = vld [vmem:[#allocation4 + $0x30] sm:$0xff]  }
 0x2f5   : > { %4836 = vmatmul.mubr.msk.bf16.vlgmr.msra.gmra.mxu0 %vm488_vm9, %v4834_v33  ;;  %4842 = vmatprep.subr.msk.bf16.mxu0 %vm492_vm8, %v3403_v54  ;;  %v5028_v54 = vld [vmem:[#allocation4 + $0x20] sm:$0xff]  }
 0x2f6   : > { %3436 = vmatpush1.bf16.msra.mxu0 %v3410_v51  ;;  %3453 = vmatprep.mubr.bf16.mxu0 %v5147_v6  ;;  %v5029_v51 = vld [vmem:[#allocation4 + $0xa8] sm:$0xff]  }
 0x2f7   : > { %v3625_v55 = vpop.permute.xlu1 %3624  ;;  %v3401_v46 = vpop.permute.xlu0 %3400 }
 0x2f9   : > { %4838 = vmatmul.mubr.msk.bf16.vlgmr.msra.gmra.mxu1 %vm488_vm9, %v4834_v33  ;;  %v5024_v33 = vld [vmem:[#allocation4 + $0x28] sm:$0xff]  }
 0x2fa   : > { %3494 = vmatprep.mubr.bf16.mxu1 %v5147_v6 }
 0x2fb   : > { %v3399_v58 = vpop.permute.xlu1 %3398  ;;  %v3623_v60 = vpop.permute.xlu0 %3622 }
 0x2fc   : > { %v3404_v57 = vsel %vm1037_vm3, %v3397_v10, %v3399_v58  ;;  %v3405_v61 = vsel %vm1037_vm3, %v3399_v58, %v3401_v46  ;;  %v3630_v62 = vsel %vm806_vm2, %v3621_v53, %v3623_v60  ;;  %v3631_v63 = vsel %vm806_vm2, %v3623_v60, %v3625_v55  ;;  %v5026_v53 = vld [vmem:[#allocation4 + $0x60] sm:$0xff]   ;;  %v5027_v10 = vld [vmem:[#allocation4 + $0xe8] sm:$0xff]   ;;  %v5034_v60 = vld [vmem:[#allocation4 + $0x50] sm:$0xff]  }
 0x2fd   : > { %v3416_v0 = vsel %vm492_vm8, %v3404_v57, 0  ;;  %v3638_v1 = vsel %vm492_vm8, %v3630_v62, 0  ;;  %4843 = vmatmul.mubr.msk.bf16.vlgmr.msra.gmra.mxu0 %vm488_vm9, %v4841_v56  ;;  %4844 = vmatprep.subr.msk.bf16.mxu1 %vm492_vm8, %v3405_v61  ;;  %v5031_v46 = vld [vmem:[#allocation4 + $0xe0] sm:$0xff]   ;;  %v5035_v57 = vld [vmem:[#allocation4 + $0xd8] sm:$0xff]   ;;  %v5036_v61 = vld [vmem:[#allocation4 + $0x10] sm:$0xff]  }
 0x2fe   : > { %4849 = vmatprep.subr.msk.bf16.mxu0 %vm492_vm8, %v3631_v63  ;;  %3477 = vmatpush1.bf16.msra.mxu1 %v3416_v0  ;;  %v5033_v58 = vld [vmem:[#allocation4 + $0xa0] sm:$0xff]   ;;  %v5037_v62 = vld [vmem:[#allocation4 + $0x98] sm:$0xff]   ;;  %v5038_v63 = vld [vmem:[#allocation4 + $0x48] sm:$0xff]  }
 0x2ff   : > { %3664 = vmatpush1.bf16.msra.mxu0 %v3638_v1  ;;  %v3629_v2 = vpop.permute.xlu1 %3628  ;;  %v3849_v3 = vpop.permute.xlu0 %3848  ;;  %3681 = vmatprep.mubr.bf16.mxu0 %v5147_v6  ;;  %v5039_v0 = vld [vmem:[#allocation4 + $0xd0] sm:$0xff]   ;;  %v5040_v1 = vld [vmem:[#allocation4 + $0x8] sm:$0xff]  }
 0x301   : > { %4845 = vmatmul.mubr.msk.bf16.vlgmr.msra.gmra.mxu1 %vm488_vm9, %v4841_v56  ;;  %v5032_v56 = vld [vmem:[#allocation4 + $0x18] sm:$0xff]  }
 0x302   : > { %3722 = vmatprep.mubr.bf16.mxu1 %v5147_v6 }
 0x303   : > { %v3851_v5 = vpop.permute.xlu1 %3850  ;;  %v3627_v7 = vpop.permute.xlu0 %3626 }
 0x304   : > { %v3632_v9 = vsel %vm806_vm2, %v3625_v55, %v3627_v7  ;;  %v3633_v11 = vsel %vm806_vm2, %v3627_v7, %v3629_v2  ;;  %v3858_v14 = vsel %vm439_vm0, %v3849_v3, %v3851_v5  ;;  %v5030_v55 = vld [vmem:[#allocation4 + $0x58] sm:$0xff]   ;;  %v5041_v2 = vld [vmem:[#allocation4 + $0x90] sm:$0xff]   ;;  %v5042_v3 = vld [vmem:[#allocation4 + $0x40] sm:$0xff]  }
 0x305   : > { %v3644_v13 = vsel %vm492_vm8, %v3632_v9, 0  ;;  %4850 = vmatmul.mubr.msk.bf16.vlgmr.msra.gmra.mxu0 %vm488_vm9, %v4848_v4  ;;  %4851 = vmatprep.subr.msk.bf16.mxu1 %vm492_vm8, %v3633_v11  ;;  %v3866_v21 = vsel %vm492_vm8, %v3858_v14, 0  ;;  %v5045_v7 = vld [vmem:[#allocation4 + $0x88] sm:$0xff]   ;;  %v5046_v9 = vld [vmem:[#allocation4 + $0xc0] sm:$0xff]  }
 0x306   : > { %3705 = vmatpush1.bf16.msra.mxu1 %v3644_v13  ;;  %3909 = vmatprep.mubr.bf16.mxu0 %v5147_v6  ;;  %v5047_v11 = vld [vmem:[#allocation4 + $0x80] sm:$0xff]  }
 0x307   : > { %v4077_v16 = vpop.permute.xlu1 %4076  ;;  %v3853_v17 = vpop.permute.xlu0 %3852 }
 0x308   : > { %v3859_v18 = vsel %vm439_vm0, %v3851_v5, %v3853_v17  ;;  %v5044_v5 = vld [vmem:[#allocation4] sm:$0xff]  }
 0x309   : > { %4852 = vmatmul.mubr.msk.bf16.vlgmr.msra.gmra.mxu1 %vm488_vm9, %v4848_v4  ;;  %4856 = vmatprep.subr.msk.bf16.mxu0 %vm492_vm8, %v3859_v18  ;;  %v5043_v4 = vld [vmem:[#allocation4 + $0xc8] sm:$0xff]  }
 0x30a   : > { %3892 = vmatpush1.bf16.msra.mxu0 %v3866_v21  ;;  %3950 = vmatprep.mubr.bf16.mxu1 %v5147_v6 }
 0x30b   : > { %v3855_v23 = vpop.permute.xlu1 %3854  ;;  %v3857_v24 = vpop.permute.xlu0 %3856 }
 0x30c   : > { %v3860_v29 = vsel %vm439_vm0, %v3853_v17, %v3855_v23  ;;  %v3861_v30 = vsel %vm439_vm0, %v3855_v23, %v3857_v24 }
 0x30d   : > { %v3872_v31 = vsel %vm492_vm8, %v3860_v29, 0  ;;  %4857 = vmatmul.mubr.msk.bf16.vlgmr.msra.gmra.mxu0 %vm488_vm9, %v4855_v22  ;;  %4858 = vmatprep.subr.msk.bf16.mxu1 %vm492_vm8, %v3861_v30 }
 0x30e   : > { %3933 = vmatpush1.bf16.msra.mxu1 %v3872_v31  ;;  %4137 = vmatprep.mubr.bf16.mxu0 %v5147_v6 }
 0x30f   : > { %v4081_v12 = vpop.permute.xlu1 %4080  ;;  %v4079_v35 = vpop.permute.xlu0 %4078 }
 0x310   : > { %v4086_v41 = vsel %vm353_vm1, %v4077_v16, %v4079_v35  ;;  %v4087_v42 = vsel %vm353_vm1, %v4079_v35, %v4081_v12 }
 0x311   : > { %v4094_v8 = vsel %vm492_vm8, %v4086_v41, 0  ;;  %4859 = vmatmul.mubr.msk.bf16.vlgmr.msra.gmra.mxu1 %vm488_vm9, %v4855_v22  ;;  %4863 = vmatprep.subr.msk.bf16.mxu0 %vm492_vm8, %v4087_v42 }
 0x312   : > { %4120 = vmatpush1.bf16.msra.mxu0 %v4094_v8  ;;  %4178 = vmatprep.mubr.bf16.mxu1 %v5147_v6 }
 0x313   : > { %v4085_v48 = vpop.permute.xlu1 %4084  ;;  %v4083_v49 = vpop.permute.xlu0 %4082  ;;  %4867 = vmatprep.subr.msk.bf16.mxu0 %vm492_vm8, %v4208_v36 }
 0x314   : > { %v4088_v20 = vsel %vm353_vm1, %v4081_v12, %v4083_v49  ;;  %v4089_v19 = vsel %vm353_vm1, %v4083_v49, %v4085_v48 }
 0x315   : > { %v4100_v32 = vsel %vm492_vm8, %v4088_v20, 0  ;;  %4864 = vmatmul.mubr.msk.bf16.vlgmr.msra.gmra.mxu0 %vm488_vm9, %v4862_v47  ;;  %4865 = vmatprep.subr.msk.bf16.mxu1 %vm492_vm8, %v4089_v19 }
 0x316   : > { %4161 = vmatpush1.bf16.msra.mxu1 %v4100_v32  ;;  %4240 = vmatpush1.bf16.msra.mxu0 %v4214_v15 }
 0x317   : > { %4257 = vmatprep.mubr.bf16.mxu0 %v5147_v6  ;;  %4869 = vmatprep.subr.msk.bf16.mxu1 %vm492_vm8, %v4209_v50 }
 0x318   : > { %4908 = vmatprep.subr.bf16.mxu0 %v5016_v39 }
 0x319   : > { %4866 = vmatmul.mubr.msk.bf16.vlgmr.msra.gmra.mxu1 %vm488_vm9, %v4862_v47 }
 0x31a   : > { %4281 = vmatpush1.bf16.msra.mxu1 %v4220_v34  ;;  %4298 = vmatprep.mubr.bf16.mxu1 %v5147_v6  ;;  %v5025_v6 = vld [vmem:[#allocation4 + $0xb0] sm:$0xff]  }
 0x31b   : > { %4930 = vmatprep.subr.bf16.mxu1 %v5019_v59 }
 0x31d   : > { %4868 = vmatmul.mubr.msk.bf16.vlgmr.msra.gmra.mxu0 %vm488_vm9, %v4191_v37 }
 0x31e   : > { %4909 = vmatpush3.bf16.msra.mxu0 %v5017_v28 }
 0x31f   : > { %4910 = vmatprep.subr.bf16.mxu0 %v5018_v43 }
 0x321   : > { %4870 = vmatmul.mubr.msk.bf16.vlgmr.msra.gmra.mxu1 %vm488_vm9, %v4191_v37 }
 0x322   : > { %4911 = vmatpush3.bf16.msra.mxu0 %v5020_v45  ;;  %4931 = vmatpush3.bf16.msra.mxu1 %v5021_v52 }
 0x323   : > { %4912 = vmatprep.subr.bf16.mxu0 %v5022_v38  ;;  %4932 = vmatprep.subr.bf16.mxu1 %v5023_v44 }
 0x326   : > { %4913 = vmatpush3.bf16.msra.mxu0 %v5024_v33  ;;  %4933 = vmatpush3.bf16.msra.mxu1 %v5025_v6 }
 0x327   : > { %4914 = vmatprep.subr.bf16.mxu0 %v5026_v53  ;;  %4934 = vmatprep.subr.bf16.mxu1 %v5027_v10 }
 0x32a   : > { %4915 = vmatpush3.bf16.msra.mxu0 %v5028_v54  ;;  %4935 = vmatpush3.bf16.msra.mxu1 %v5029_v51 }
 0x32b   : > { %4916 = vmatprep.subr.bf16.mxu0 %v5030_v55  ;;  %4936 = vmatprep.subr.bf16.mxu1 %v5031_v46 }
 0x32e   : > { %4917 = vmatpush3.bf16.msra.mxu0 %v5032_v56  ;;  %4937 = vmatpush3.bf16.msra.mxu1 %v5033_v58 }
 0x32f   : > { %4918 = vmatprep.subr.bf16.mxu0 %v5034_v60  ;;  %4938 = vmatprep.subr.bf16.mxu1 %v5035_v57 }
 0x332   : > { %4919 = vmatpush3.bf16.msra.mxu0 %v5036_v61  ;;  %4939 = vmatpush3.bf16.msra.mxu1 %v5037_v62 }
 0x333   : > { %4920 = vmatprep.subr.bf16.mxu0 %v5038_v63  ;;  %4940 = vmatprep.subr.bf16.mxu1 %v5039_v0 }
 0x336   : > { %4921 = vmatpush3.bf16.msra.mxu0 %v5040_v1  ;;  %4941 = vmatpush3.bf16.msra.mxu1 %v5041_v2 }
 0x337   : > { %4922 = vmatprep.subr.bf16.mxu0 %v5042_v3  ;;  %4942 = vmatprep.subr.bf16.mxu1 %v5043_v4 }
 0x33a   : > { %4923 = vmatpush3.bf16.msra.mxu0 %v5044_v5  ;;  %4943 = vmatpush3.bf16.msra.mxu1 %v5045_v7 }
 0x33b   : > { %4944 = vmatprep.subr.bf16.mxu1 %v5046_v9 }
 0x33e   : > { %4945 = vmatpush3.bf16.msra.mxu1 %v5047_v11 }
 0x395   : > { %v2516_v13 = vpop.f32.mrf.mxu0 }
 0x397   : > { %v2518_v14 = vpop.f32.mrf.mxu0 }
 0x399   : > { %v2520_v16 = vpop.f32.mrf.mxu0  ;;  %v2557_v17 = vpop.f32.mrf.mxu1 }
 0x39b   : > { %v2521_v18 = vpop.f32.mrf.mxu0  ;;  %v5895_v21 = vpop.f32.mrf.mxu1 }
 0x39d   : > { %v2561_v22 = vpop.f32.mrf.mxu1  ;;  %v2653_v23 = vpop.f32.mrf.mxu0 }
 0x39e   : > { %v2654_v1 = vadd.f32 %v2653_v23, %v2516_v13 }
 0x39f   : > { %v2562_v24 = vpop.f32.mrf.mxu1  ;;  %v2655_v25 = vpop.f32.mrf.mxu0 }
 0x3a0   : > { %v2656_v4 = vadd.f32 %v2655_v25, %v2518_v14 }
 0x3a1   : > { %v2657_v26 = vpop.f32.mrf.mxu0  ;;  %v2694_v27 = vpop.f32.mrf.mxu1 }
 0x3a2   : > { %v2695_v16 = vadd.f32 %v2694_v27, %v2557_v17 }
 0x3a3   : > { %v2658_v29 = vpop.f32.mrf.mxu0  ;;  %v2696_v30 = vpop.f32.mrf.mxu1 }
 0x3a4   : > { %v2697_v26 = vadd.f32 %v2696_v30, %v5895_v21 }
 0x3a5   : > { %v2698_v31 = vpop.f32.mrf.mxu1  ;;  %v2877_v12 = vpop.f32.mrf.mxu0 }
 0x3a6   : > { %v2925_v5 = vadd.f32 %v2877_v12, %v2654_v1 }
 0x3a7   : > { %v2699_v35 = vpop.f32.mrf.mxu1  ;;  %v2879_v36 = vpop.f32.mrf.mxu0 }
 0x3a8   : > { %v2926_v11 = vadd.f32 %v2879_v36, %v2656_v4 }
 0x3a9   : > { %v2881_v40 = vpop.f32.mrf.mxu0  ;;  %v2918_v41 = vpop.f32.mrf.mxu1 }
 0x3aa   : > { %v2927_v31 = vadd.f32 %v2918_v41, %v2695_v16 }
 0x3ab   : > { %v2882_v42 = vpop.f32.mrf.mxu0  ;;  %v2920_v8 = vpop.f32.mrf.mxu1 }
 0x3ad   : > { %v2922_v47 = vpop.f32.mrf.mxu1  ;;  %v3105_v48 = vpop.f32.mrf.mxu0 }
 0x3ae   : > { %v3153_v18 = vadd.f32 %v3105_v48, %v2925_v5  ;;  %v2928_v47 = vadd.f32 %v2920_v8, %v2697_v26 }
 0x3af   : > { %v2923_v49 = vpop.f32.mrf.mxu1  ;;  %v3107_v15 = vpop.f32.mrf.mxu0 }
 0x3b0   : > { %v3154_v29 = vadd.f32 %v3107_v15, %v2926_v11 }
 0x3b1   : > { %v3109_v50 = vpop.f32.mrf.mxu0  ;;  %v3146_v20 = vpop.f32.mrf.mxu1 }
 0x3b2   : > { %v3155_v23 = vadd.f32 %v3146_v20, %v2927_v31 }
 0x3b3   : > { %v3110_v19 = vpop.f32.mrf.mxu0  ;;  %v3148_v32 = vpop.f32.mrf.mxu1 }
 0x3b4   : > { %v3156_v12 = vadd.f32 %v3148_v32, %v2928_v47 }
 0x3b5   : > { %v3150_v34 = vpop.f32.mrf.mxu1  ;;  %v3227_v37 = vpop.f32.mrf.mxu0 }
 0x3b6   : > { %v3275_v35 = vadd.f32 %v3227_v37, %v3153_v18 }
 0x3b7   : > { %v3151_v39 = vpop.f32.mrf.mxu1  ;;  %v3229_v28 = vpop.f32.mrf.mxu0 }
 0x3b8   : > { %v3276_v13 = vadd.f32 %v3229_v28, %v3154_v29 }
 0x3b9   : > { %v3231_v43 = vpop.f32.mrf.mxu0  ;;  %v3268_v59 = vpop.f32.mrf.mxu1 }
 0x3ba   : > { %v3277_v36 = vadd.f32 %v3268_v59, %v3155_v23 }
 0x3bb   : > { %v3232_v45 = vpop.f32.mrf.mxu0  ;;  %v3270_v52 = vpop.f32.mrf.mxu1 }
 0x3bc   : > { %v3278_v19 = vadd.f32 %v3270_v52, %v3156_v12 }
 0x3bd   : > { %v3272_v38 = vpop.f32.mrf.mxu1  ;;  %v3455_v44 = vpop.f32.mrf.mxu0 }
 0x3be   : > { %v3503_v49 = vadd.f32 %v3455_v44, %v3275_v35 }
 0x3bf   : > { %v3273_v33 = vpop.f32.mrf.mxu1  ;;  %v3457_v6 = vpop.f32.mrf.mxu0 }
 0x3c0   : > { %v3504_v50 = vadd.f32 %v3457_v6, %v3276_v13 }
 0x3c1   : > { %v3459_v53 = vpop.f32.mrf.mxu0  ;;  %v3496_v10 = vpop.f32.mrf.mxu1 }
 0x3c2   : > { %v3505_v21 = vadd.f32 %v3496_v10, %v3277_v36 }
 0x3c3   : > { %v3460_v54 = vpop.f32.mrf.mxu0  ;;  %v3498_v51 = vpop.f32.mrf.mxu1 }
 0x3c4   : > { %v3506_v37 = vadd.f32 %v3498_v51, %v3278_v19 }
 0x3c5   : > { %v3500_v55 = vpop.f32.mrf.mxu1  ;;  %v3683_v46 = vpop.f32.mrf.mxu0 }
 0x3c6   : > { %v3731_v17 = vadd.f32 %v3683_v46, %v3503_v49 }
 0x3c7   : > { %v3501_v56 = vpop.f32.mrf.mxu1  ;;  %v3685_v58 = vpop.f32.mrf.mxu0 }
 0x3c8   : > { %v3732_v34 = vadd.f32 %v3685_v58, %v3504_v50 }
 0x3c9   : > { %v3687_v60 = vpop.f32.mrf.mxu0  ;;  %v3724_v57 = vpop.f32.mrf.mxu1 }
 0x3ca   : > { %v3733_v8 = vadd.f32 %v3724_v57, %v3505_v21 }
 0x3cb   : > { %v3688_v61 = vpop.f32.mrf.mxu0  ;;  %v3726_v62 = vpop.f32.mrf.mxu1 }
 0x3cc   : > { %v3734_v45 = vadd.f32 %v3726_v62, %v3506_v37 }
 0x3cd   : > { %v3728_v63 = vpop.f32.mrf.mxu1  ;;  %v3911_v0 = vpop.f32.mrf.mxu0 }
 0x3ce   : > { %v3959_v30 = vadd.f32 %v3911_v0, %v3731_v17 }
 0x3cf   : > { %v3729_v2 = vpop.f32.mrf.mxu1  ;;  %v3913_v3 = vpop.f32.mrf.mxu0 }
 0x3d0   : > { %v3960_v39 = vadd.f32 %v3913_v3, %v3732_v34 }
 0x3d1   : > { %v3915_v7 = vpop.f32.mrf.mxu0  ;;  %v3952_v9 = vpop.f32.mrf.mxu1 }
 0x3d2   : > { %v3961_v32 = vadd.f32 %v3952_v9, %v3733_v8 }
 0x3d3   : > { %v3916_v22 = vpop.f32.mrf.mxu0  ;;  %v3954_v24 = vpop.f32.mrf.mxu1 }
 0x3d4   : > { %v3962_v6 = vadd.f32 %v3954_v24, %v3734_v45 }
 0x3d5   : > { %v3956_v40 = vpop.f32.mrf.mxu1  ;;  %v4139_v42 = vpop.f32.mrf.mxu0 }
 0x3d6   : > { %v4187_v28 = vadd.f32 %v4139_v42, %v3959_v30 }
 0x3d7   : > { %v3957_v14 = vpop.f32.mrf.mxu1  ;;  %v4141_v25 = vpop.f32.mrf.mxu0 }
 0x3d8   : > { %v4188_v38 = vadd.f32 %v4141_v25, %v3960_v39 }
 0x3d9   : > { %v4143_v27 = vpop.f32.mrf.mxu0  ;;  %v4180_v48 = vpop.f32.mrf.mxu1 }
 0x3da   : > { %v4189_v52 = vadd.f32 %v4180_v48, %v3961_v32 }
 0x3db   : > { %v4144_v41 = vpop.f32.mrf.mxu0  ;;  %v4182_v15 = vpop.f32.mrf.mxu1 }
 0x3dc   : > { %v4190_v55 = vadd.f32 %v4182_v15, %v3962_v6 }
 0x3dd   : > { %v4184_v20 = vpop.f32.mrf.mxu1  ;;  %v4259_v43 = vpop.f32.mrf.mxu0 }
 0x3de   : > { %v4307_v44 = vadd.f32 %v4259_v43, %v4187_v28 }
 0x3df   : > { %v4185_v59 = vpop.f32.mrf.mxu1  ;;  %v4261_v33 = vpop.f32.mrf.mxu0 }
 0x3e0   : > { %v4308_v53 = vadd.f32 %v4261_v33, %v4188_v38  ;;  %v4311_v51 = vpack.c.bf16 %v4307_v44, %v4307_v44 }
 0x3e1   : > { %v4300_v54 = vpop.f32.mrf.mxu1  ;;  %v4263_v10 = vpop.f32.mrf.mxu0 }
 0x3e2   : > { %v4312_v46 = vpack.c.bf16 %v4308_v53, %v4308_v53  ;;  %v4309_v56 = vadd.f32 %v4300_v54, %v4189_v52 }
 0x3e3   : > { %v4302_v58 = vpop.f32.mrf.mxu1  ;;  %v4264_v60 = vpop.f32.mrf.mxu0 }
 0x3e4   : > { %v4310_v57 = vadd.f32 %v4302_v58, %v4190_v55  ;;  %4603 = vmatprep.mubr.bf16.mxu0 %v4312_v46  ;;  %v4313_v63 = vpack.c.bf16 %v4309_v56, %v4309_v56 }
 0x3e5   : > { %v4304_v61 = vpop.f32.mrf.mxu1  ;;  %4604 = vmatmul.mubr.bf16.vlgmr.msra.gmra.mxu0 %v4311_v51 }
 0x3e6   : > { %v4314_v62 = vpack.c.bf16 %v4310_v57, %v4310_v57 }
 0x3e7   : > { %v4305_v0 = vpop.f32.mrf.mxu1 }
 0x3e8   : > { %4643 = vmatprep.mubr.bf16.mxu1 %v4314_v62 }
 0x3e9   : > { %4644 = vmatmul.mubr.bf16.vlgmr.msra.gmra.mxu1 %v4313_v63 }
 0x4a5   : > { %v4924_v1 = vpop.f32.mrf.mxu0 }
 0x4a7   : > { %v4925_v2 = vpop.f32.mrf.mxu0 }
 0x4a8   : > { %v4926_v9 = vadd.f32 %v4925_v2, %v4924_v1 }
 0x4a9   : > { %v4927_v3 = vpop.f32.mrf.mxu0  ;;  %v4946_v4 = vpop.f32.mrf.mxu1 }
 0x4ab   : > { %v4928_v5 = vpop.f32.mrf.mxu0  ;;  %v4947_v7 = vpop.f32.mrf.mxu1 }
 0x4ac   : > { %v4948_v11 = vadd.f32 %v4947_v7, %v4946_v4 }
 0x4ad   : > { %v4949_v16 = vpop.f32.mrf.mxu1 }
 0x4ae   : > { %v4646_v18 = vadd.f32 %v4948_v11, %v4926_v9 }
 0x4af   : > { %v4950_v22 = vpop.f32.mrf.mxu1 }
 0x4b0   : > { %v4651_v24 = vpack.c.bf16 %v4646_v18, %v4646_v18 }
 0x4b2   : > { %4652 = vst [vmem:[%s259_s26] sm:$0xf] %v4651_v24 }
 0x4b3   : > { %5089 = shalt.err (!%p5086_p0)
}
 0x4b4   : > { %s5090_s18 = scalar_lea.hbm %s4665_s17, 64  ;;  %s5094_s13 = scalar_lea.hbm %s5938_s6, 128 }
 0x4b5   : > { %p5091_p1 = scmp.ne.s32.totalorder %s4665_s17, %s5090_s18  ;;  %p5095_p4 = scmp.lt.s32.totalorder %s4665_s17, %s5938_s6 }
 0x4b6   : > { %p5096_p7 = scmp.lt.s32.totalorder %s5094_s13, %s5090_s18 }
 0x4b7   : > { %p5092_p2 = pnand %p5091_p1, %p5230_p5 }
 0x4b8   : > { %p5097_p6 = por %p5096_p7, %p5095_p4 }
 0x4b9   : > { %p5093_p3 = pneg %p5092_p2 }
 0x4bb   : > { %p5098_p8 = pnand %p5097_p6, %p5093_p3 }
 0x4bd   : > { %5101 = shalt.err (!%p5098_p8)
}
 0x4be   : > { %4956 = dma.vmem_to_hbm [thread:$0]  (%p5230_p5), %s4668_s28, 64, %s4665_s17, %s4654_s20  }
 0x4bf PF: > { %p4968_p9 = scmp.ge.s32.totalorder %s5140_s24, 2  ;;  %s4679_s26 = sand.u32 1, %s5128_s21  }
 0x4c0   : > { %p5942_p10 = scmp.ne.s32.totalorder %s5940_s8, 0  ;;  %s4680_s29 = scalar_lea.sflag [#allocation6], %s4679_s26 }
 0x4c2   : > { %p4963_p11 = pnand %p4968_p9, %p5942_p10 }
 0x4c4   : > { %p4964_p12 = pneg %p4963_p11 }
 0x4c6   : > { %5123 = dma.done.wait (%p4964_p12), %s4680_s29, 64  }
 0x4c7   : > { %5125 = vsyncadd (%p4964_p12), %s4680_s29, 4294967232  ;;  %p17_p13 = scmp.ge.s32.totalorder %s5217_s27, 4   ;;  %s5943_s21 = smov %s5132_s22 }
 0x4c8   : > { %s5944_s22 = smov %s5136_s23  ;;  %s5945_s23 = smov %s5228_s30 }
 0x4c9   : > { %s5946_s24 = smov %s5217_s27  ;;  %19 = sbr.rel (!%p17_p13) target bundleno = 4 (0x4), region = 107 }
 0x4ce   :  { %4685 = vsyncpa [#allocation5], 1 }
 0x4cf   :  { %4687 = vsyncpa [#allocation5 + $0x1], 1 }
 0x4d0   :  { %4688 = vsyncpa [#allocation6], 1 }
 0x4d1   :  { %4690 = vsyncpa [#allocation6 + $0x1], 1 }

</bundles_post_ra>
